<compile_context>
chip_gen: v7x
topology: tpu7x:2x2x1
jax: 0.10.0
libtpu: 0.0.40
codegen_flags: <defaults>
</compile_context>

<pallas_src>
import functools
import math

import jax
import jax.numpy as jnp
import numpy as np
from jax.experimental import pallas as pl
from jax.experimental.pallas import tpu as pltpu

NUM_CLASSES = 4

TARGET_FOLD_ROWS = 128        # MXU-row target after folding lanes into rows
INPUT_VMEM_BUDGET = 12 << 20  # bytes for the double-buffered (RF, tk) input block
MAX_TK = 8192                 # lane-tile cap (pipeline granularity / pad waste)
VMEM_LIMIT_BYTES = 32 * 1024 * 1024
# Keep f32 on the MXU: the validated tolerances hold at f32 and the covariance
# (recovered by double-centering) cancels catastrophically if inputs are
# rounded to bf16 (see perf-review correctness note).  Set to jnp.bfloat16 for
# native-rate MXU when cov accuracy has been re-validated for your gradients.
MXU_DTYPE = jnp.float32


def _round_up(x, m):
    return ((x + m - 1) // m) * m


def _fold_factor(R):
    """Fold factor s so that s*R is close to TARGET_FOLD_ROWS (and a multiple of 8
    whenever possible)."""
    if R >= TARGET_FOLD_ROWS:
        return 1
    s = max(1, TARGET_FOLD_ROWS // R)
    base = 8 // math.gcd(R, 8)
    if base <= s:
        s = (s // base) * base
    return max(s, 1)


# ----------------------------------------------------------------------------
# Pallas kernel: batched folded-Gram accumulation over a flat block grid.
#
# Input : packed (RF, T*tk) f32 where RF = s*R are the folded rows.  Flat block
#         t owns packed columns [col[t]*tk, (col[t]+1)*tk) and belongs to group
#         gid[t]; first[t] marks the first block of a (core, group) run and
#         valid[t]==0 marks a dummy (padding) step.
# Output: (NC, G, RF, RF) f32 partial Grams; each visited (core, group) slice
#         holds sum over its blocks of  A_blk @ A_blk^T.
# ----------------------------------------------------------------------------
@functools.lru_cache(maxsize=None)
def _make_gram_call(NC, K, G, RF, tk):

    def kernel(gid_ref, col_ref, first_ref, valid_ref, x_ref, out_ref):
        c = pl.program_id(0)
        i = pl.program_id(1)
        t = c * K + i

        @pl.when(first_ref[t] == 1)
        def _init():
            out_ref[...] = jnp.zeros(out_ref.shape, out_ref.dtype)

        @pl.when(valid_ref[t] == 1)
        def _accumulate():
            a = x_ref[...].astype(MXU_DTYPE)                    # (RF, tk)
            prod = jax.lax.dot_general(                         # (RF, RF)
                a, a, (((1,), (1,)), ((), ())),
                preferred_element_type=jnp.float32)
            out_ref[...] += prod[None, None]

    in_map = lambda c, i, gid, col, first, valid: (0, col[c * K + i])
    out_map = lambda c, i, gid, col, first, valid: (c, gid[c * K + i], 0, 0)

    return pl.pallas_call(
        kernel,
        out_shape=jax.ShapeDtypeStruct((NC, G, RF, RF), jnp.float32),
        grid_spec=pltpu.PrefetchScalarGridSpec(
            num_scalar_prefetch=4,
            grid=(NC, K),
            in_specs=[pl.BlockSpec((RF, tk), in_map)],
            out_specs=pl.BlockSpec((1, 1, RF, RF), out_map),
        ),
        compiler_params=pltpu.CompilerParams(
            dimension_semantics=("parallel", "arbitrary"),
            vmem_limit_bytes=VMEM_LIMIT_BYTES),
    )


def _batched_gram(mats, B, has2):
    """mats: list of (R, d_g) f32 gradient matrices (R = 2B stacked [G1;G2] if
    has2 else B).  Returns ((G, s*R, s*R) accumulators, R, s)."""
    G = len(mats)
    R = int(mats[0].shape[0])
    s = _fold_factor(R)
    RF = s * R
    dims = [int(m.shape[1]) for m in mats]

    # lane tile from a VMEM budget (double-buffered input block), capped by the
    # widest folded group so tiny models don't over-pad.
    max_chunk = max(max(1, -(-d // s)) for d in dims)
    tk_budget = max(128, (INPUT_VMEM_BUDGET // (2 * RF * 4)) // 128 * 128)
    tk = max(128, min(tk_budget, MAX_TK, _round_up(max_chunk, 128)))

    # pack: fold each group's (R, d) into (RF, chunk) by stacking column chunks,
    # then concatenate groups along the lane axis.
    # TODO(synk): emit the folded/packed layout directly from the per-sample
    # grad computation (or stream per-group grads via ANY-space DMA) to avoid
    # this extra HBM pass over the gradients.
    cols, gid_list, col_list = [], [], []
    base = 0
    for g, (m, d) in enumerate(zip(mats, dims)):
        chunk = _round_up(max(1, -(-d // s)), tk)
        dp = s * chunk
        xpad = jnp.pad(m.astype(jnp.float32), ((0, 0), (0, dp - d)))
        folded = xpad.reshape(R, s, chunk).transpose(1, 0, 2).reshape(RF, chunk)
        cols.append(folded)
        nk = chunk // tk
        for k in range(nk):
            gid_list.append(g)
            col_list.append(base + k)
        base += nk
    packed = cols[0] if len(cols) == 1 else jnp.concatenate(cols, axis=1)

    # flat block list -> NC balanced contiguous chunks (megacore on v7x).
    T = len(gid_list)
    NC = 2 if T >= 2 else 1
    K = -(-T // NC)
    gid = np.zeros(NC * K, np.int32)
    col = np.zeros(NC * K, np.int32)
    first = np.zeros(NC * K, np.int32)
    valid = np.zeros(NC * K, np.int32)
    visited = np.zeros((NC, G), np.float32)
    for c in range(NC):
        lo, hi = c * K, min((c + 1) * K, T)
        prev_g = -1
        for j, t in enumerate(range(lo, hi)):
            p = c * K + j
            gid[p] = gid_list[t]
            col[p] = col_list[t]
            valid[p] = 1
            first[p] = 1 if (j == 0 or gid_list[t] != prev_g) else 0
            prev_g = gid_list[t]
            visited[c, gid_list[t]] = 1.0
        n_real = hi - lo
        for j in range(n_real, K):      # dummy tail steps: elided DMA, skipped compute
            p = c * K + j
            src = c * K + n_real - 1 if n_real > 0 else 0
            gid[p] = gid[src] if n_real > 0 else (gid_list[0] if T else 0)
            col[p] = col[src] if n_real > 0 else (col_list[0] if T else 0)
            first[p] = 1 if j == 0 else 0
            valid[p] = 0

    call = _make_gram_call(NC, K, G, RF, tk)
    out = call(jnp.asarray(gid), jnp.asarray(col), jnp.asarray(first),
               jnp.asarray(valid), packed)                       # (NC, G, RF, RF)

    # reduce over the core axis, masking never-visited (uninitialised) slices.
    mask = jnp.asarray(visited)[:, :, None, None] > 0.5
    acc = jnp.sum(jnp.where(mask, out, 0.0), axis=0)             # (G, RF, RF)
    return acc, R, s


def _metrics_from_acc(acc_fold, B, R, s, has2, graham_from_cov=False):
    """Finalize one folded Gram accumulator into {ind: (sim, gram, cov)}."""
    af = acc_fold.reshape(s, R, s, R)
    P = jnp.trace(af, axis1=0, axis2=2)              # (R, R) = [G1;G2] @ [G1;G2].T
    norms = 1e-9 + jnp.sqrt(jnp.diagonal(P))         # torch: g / (1e-9 + ||g||)
    inv_b = 1.0 / B

    def block(rx, ry):
        dot = P[rx:rx + B, ry:ry + B]
        sim = dot / (norms[rx:rx + B, None] * norms[None, ry:ry + B])
        # (Gx - 1 mx)(Gy - 1 my)^T == double-centered dot block
        cov = (dot - jnp.mean(dot, axis=1, keepdims=True)
                   - jnp.mean(dot, axis=0, keepdims=True)
                   + jnp.mean(dot)) * inv_b
        gram = cov if graham_from_cov else dot * inv_b
        return sim, gram, cov

    pairs = {'11': (0, 0)}
    if has2:
        pairs['22'] = (B, B)
        pairs['12'] = (0, B)
    out = {}
    for ind, (rx, ry) in pairs.items():
        sim, gram, cov = block(rx, ry)
        if ind != '12':                              # hermitian symmetrization
            sim = 0.5 * (sim + sim.T)
            gram = 0.5 * (gram + gram.T)
            cov = 0.5 * (cov + cov.T)
        out[ind] = (sim, gram, cov)
    return out


# ----------------------------------------------------------------------------
# Synthetic model (stands in for `model` passed to PerSampleGrad.__init__):
#   Conv2d(4, 16, 3, padding=1) -> ReLU -> global avg pool -> Linear(16, 4)
# Layout: activations NCHW, conv weights OIHW (PyTorch convention).
# ----------------------------------------------------------------------------
def init_params(key):
    k1, k2, k3 = jax.random.split(key, 3)
    fan_conv = 4 * 3 * 3
    return {
        'conv.weight': jax.random.normal(k1, (16, 4, 3, 3), jnp.float32)
        / math.sqrt(fan_conv),
        'conv.bias': 0.01 * jax.random.normal(k2, (16,), jnp.float32),
        'fc.weight': jax.random.normal(k3, (NUM_CLASSES, 16), jnp.float32) / 4.0,
        'fc.bias': jnp.zeros((NUM_CLASSES,), jnp.float32),
    }


def model_apply(params, x):
    y = jax.lax.conv_general_dilated(
        x, params['conv.weight'], window_strides=(1, 1), padding='SAME',
        dimension_numbers=('NCHW', 'OIHW', 'NCHW'))
    y = y + params['conv.bias'][None, :, None, None]
    y = jax.nn.relu(y)
    pooled = jnp.mean(y, axis=(2, 3))                       # (N, 16)
    return pooled @ params['fc.weight'].T + params['fc.bias']


def compute_loss(params, buffers, sample, target):
    del buffers
    batch = sample[None]                                     # (1, C, H, W)
    logits = model_apply(params, batch)                      # (1, num_classes)
    logp = jax.nn.log_softmax(logits, axis=-1)
    loss = -logp[0, target]                                  # CrossEntropyLoss, batch of 1
    return loss, logits


# mirror of torch.func: vmap(grad(compute_loss, has_aux=True), in_dims=(None,None,0,0))
_ft_grads = jax.vmap(jax.grad(compute_loss, has_aux=True),
                     in_axes=(None, None, 0, 0))
ft_criterion = jax.jit(_ft_grads)


# ----------------------------------------------------------------------------
# One jit for everything after the inputs: per-sample grads, prediction stats,
# packing, the Pallas kernel, and the tiny (B x B) finalization.
# ----------------------------------------------------------------------------
@functools.partial(jax.jit, static_argnames=("num_classes", "has2"))
def _psg_compute(params, x1, y1, x2, y2, *, num_classes, has2):
    B = y1.shape[0]

    grads1, logits1 = _ft_grads(params, {}, x1, y1)
    y_pred1 = jnp.squeeze(logits1)                           # (B, C)
    if has2:
        grads2, logits2 = _ft_grads(params, {}, x2, y2)
        y_pred2 = jnp.squeeze(logits2)

    # ---- prediction statistics (device scalars, no host syncs here) --------
    label1 = jnp.argmax(y_pred1, axis=1)
    if has2:
        label2 = jnp.argmax(y_pred2, axis=1)
        prob1 = jax.nn.softmax(y_pred1, axis=1)
        prob2 = jax.nn.softmax(y_pred2, axis=1)
    pred_stats = {}
    for idx in range(num_classes):
        # NOTE: like the PyTorch original, a class absent from the batch yields
        # a 0/0 -> NaN statistic.
        mask1 = (y1 == idx)
        cnt = jnp.sum(mask1.astype(jnp.float32))
        mis1 = jnp.sum(jnp.where(mask1, (label1 != y1).astype(jnp.float32),
                                 0.0)) / cnt
        pred_stats[f'misclassification_1_{idx}'] = mis1
        if has2:
            mis2 = jnp.sum(jnp.where(mask1, (label2 != y2).astype(jnp.float32),
                                     0.0)) / cnt
            disc = jnp.sum(jnp.where(mask1, prob1[:, idx] - prob2[:, idx],
                                     0.0)) / cnt
            pred_stats[f'misclassification_2_{idx}'] = mis2
            pred_stats[f'mean_prob_discrepancy_{idx}'] = disc

    # ---- stack per-parameter gradient matrices and run the batched kernel --
    names = list(grads1.keys())
    mats = []
    for nm in names:
        g1 = grads1[nm].reshape(B, -1).astype(jnp.float32)
        if has2:
            g2 = grads2[nm].reshape(B, -1).astype(jnp.float32)
            mats.append(jnp.concatenate([g1, g2], axis=0))   # (2B, d)
        else:
            mats.append(g1)                                  # (B, d)

    acc, R, s = _batched_gram(mats, B, has2)                 # (G, s*R, s*R)

    matrices = {'similarity_11': {}, 'graham_11': {}, 'cov_11': {}}
    scalars = {'trace_of_cov_11': {}}
    if has2:
        matrices.update({'similarity_22': {}, 'graham_22': {}, 'cov_22': {},
                         'similarity_12': {}, 'graham_12': {}, 'cov_12': {}})
        scalars['trace_of_cov_22'] = {}

    for gi, nm in enumerate(names):
        res = _metrics_from_acc(acc[gi], B, R, s, has2)
        for ind, (sim, gram, cov) in res.items():
            matrices[f'similarity_{ind}'][nm] = sim
            matrices[f'graham_{ind}'][nm] = gram
            matrices[f'cov_{ind}'][nm] = cov

    # ---- concatenated_weights: column blocks partition D, so the concatenated
    # accumulator is just the sum of the per-group accumulators. -------------
    acc_cat = jnp.sum(acc, axis=0)
    # PyTorch quirk: trace_of_cov mean-centers the stored concatenated grads IN
    # PLACE, so the subsequent "graham" equals the covariance of the raw matrix
    # (similarity still uses the raw, uncentered norms/dots).
    res = _metrics_from_acc(acc_cat, B, R, s, has2, graham_from_cov=True)
    for ind, (sim, gram, cov) in res.items():
        matrices[f'similarity_{ind}']['concatenated_weights'] = sim
        matrices[f'graham_{ind}']['concatenated_weights'] = gram
        matrices[f'cov_{ind}']['concatenated_weights'] = cov
    scalars['trace_of_cov_11']['concatenated_weights'] = jnp.trace(res['11'][2])
    if has2:
        scalars['trace_of_cov_22']['concatenated_weights'] = jnp.trace(res['22'][2])

    return matrices, scalars, pred_stats


# ----------------------------------------------------------------------------
# PerSampleGrad.forward
# ----------------------------------------------------------------------------
def per_sample_grad_forward(params, x_true1, y_true1, x_true2=None, y_true2=None):
    has2 = x_true2 is not None
    # single small sync on the labels only (mirrors `num_classes = y_true1.max()+1`)
    num_classes = int(jax.device_get(jnp.max(y_true1))) + 1

    matrices, scalars, pred_stats = _psg_compute(
        params, x_true1, y_true1,
        x_true2 if has2 else None, y_true2 if has2 else None,
        num_classes=num_classes, has2=has2)

    # one host sync at the very end for all scalar outputs
    scalars_h, pred_stats_h = jax.device_get((scalars, pred_stats))
    scalars_h = {k: {t: float(v) for t, v in d.items()} for k, d in scalars_h.items()}
    pred_stats_h = {k: float(v) for k, v in pred_stats_h.items()}
    return matrices, scalars_h, pred_stats_h


if __name__ == "__main__":
    key = jax.random.PRNGKey(0)
    kp, kx1, kx2 = jax.random.split(key, 3)
    params = init_params(kp)

    B, C, H, W = 8, 4, 16, 16
    x1 = jax.random.normal(kx1, (B, C, H, W), jnp.float32)
    x2 = jax.random.normal(kx2, (B, C, H, W), jnp.float32)
    y1 = jnp.arange(B, dtype=jnp.int32) % NUM_CLASSES
    y2 = (jnp.arange(B, dtype=jnp.int32) + 1) % NUM_CLASSES

    matrices, scalars, prediction_stats = per_sample_grad_forward(params, x1, y1, x2, y2)
    for d in matrices.values():
        for v in d.values():
            jax.block_until_ready(v)

    # ---------------- correctness check vs plain-JAX reference ----------------
    grads1, _ = ft_criterion(params, {}, x1, y1)
    grads2, _ = ft_criterion(params, {}, x2, y2)

    def ref_metrics(a, b, herm):
        an = a / (1e-9 + jnp.linalg.norm(a, axis=1, keepdims=True))
        bn = b / (1e-9 + jnp.linalg.norm(b, axis=1, keepdims=True))
        sim = an @ bn.T
        gram = a @ b.T / a.shape[0]
        ac = a - jnp.mean(a, axis=0, keepdims=True)
        bc = b - jnp.mean(b, axis=0, keepdims=True)
        cov = ac @ bc.T / a.shape[0]
        if herm:
            sim = 0.5 * (sim + sim.T)
            gram = 0.5 * (gram + gram.T)
            cov = 0.5 * (cov + cov.T)
        return sim, gram, cov

    def check(got, want):
        np.testing.assert_allclose(np.asarray(got), np.asarray(want),
                                   rtol=2e-3, atol=2e-5)

    g1 = grads1['conv.weight'].reshape(B, -1).astype(jnp.float32)
    g2 = grads2['conv.weight'].reshape(B, -1).astype(jnp.float32)
    for ind, (a, b, herm) in {'11': (g1, g1, True), '22': (g2, g2, True),
                              '12': (g1, g2, False)}.items():
        s, gm, cv = ref_metrics(a, b, herm)
        check(matrices[f'similarity_{ind}']['conv.weight'], s)
        check(matrices[f'graham_{ind}']['conv.weight'], gm)
        check(matrices[f'cov_{ind}']['conv.weight'], cv)

    cw1 = jnp.concatenate([grads1[k].reshape(B, -1) for k in grads1], axis=1)
    cw2 = jnp.concatenate([grads2[k].reshape(B, -1) for k in grads2], axis=1)
    s11, _, c11 = ref_metrics(cw1, cw1, True)
    s12, _, c12 = ref_metrics(cw1, cw2, False)
    check(matrices['similarity_11']['concatenated_weights'], s11)
    check(matrices['graham_11']['concatenated_weights'], c11)   # graham==cov quirk
    check(matrices['cov_11']['concatenated_weights'], c11)
    check(matrices['similarity_12']['concatenated_weights'], s12)
    check(matrices['cov_12']['concatenated_weights'], c12)
    cw1c = cw1 - jnp.mean(cw1, axis=0, keepdims=True)
    tr_ref = float(jnp.mean(jnp.sum(cw1c * cw1c, axis=1)))
    assert abs(scalars['trace_of_cov_11']['concatenated_weights'] - tr_ref) \
        <= 2e-3 * abs(tr_ref) + 2e-5

    print("KERNEL_OK")
</pallas_src>

<mosaic_0001>
module attributes {stable_mosaic.version = 11 : i64} {
  func.func @kernel(%arg0: i32, %arg1: i32, %arg2: memref<4xi32, #tpu.memory_space<smem>>, %arg3: memref<4xi32, #tpu.memory_space<smem>>, %arg4: memref<4xi32, #tpu.memory_space<smem>>, %arg5: memref<4xi32, #tpu.memory_space<smem>>, %arg6: memref<128x128xf32, #tpu.memory_space<vmem>>, %arg7: memref<1x1x128x128xf32, #tpu.memory_space<vmem>>) attributes {dimension_semantics = [#tpu.dimension_semantics<parallel>, #tpu.dimension_semantics<arbitrary>], iteration_bounds = array<i64: 2, 2>, scalar_prefetch = 4 : i64, scratch_operands = 0 : i64, tpu.core_type = #tpu.core_type<tc>, window_params = [{transform_indices = @transform_0, window_bounds = array<i64: 128, 128>}, {transform_indices = @transform_1, window_bounds = array<i64: 1, 1, 128, 128>}]} {
    %c2_i32 = arith.constant 2 : i32
    %0 = arith.muli %arg0, %c2_i32 : i32
    %1 = arith.addi %0, %arg1 : i32
    %2 = arith.index_cast %1 : i32 to index
    %3 = memref.load %arg4[%2] : memref<4xi32, #tpu.memory_space<smem>>
    %c1_i32 = arith.constant 1 : i32
    %4 = arith.cmpi eq, %3, %c1_i32 : i32
    %5 = arith.extui %4 : i1 to i32
    %c0_i32 = arith.constant 0 : i32
    %6 = arith.cmpi ne, %5, %c0_i32 : i32
    scf.if %6 {
      %cst = arith.constant 0.000000e+00 : f32
      %12 = vector.broadcast %cst : f32 to vector<1x1x128x128xf32>
      %c0 = arith.constant 0 : index
      %c0_2 = arith.constant 0 : index
      %c0_3 = arith.constant 0 : index
      %c0_4 = arith.constant 0 : index
      %13 = vector.load %arg7[%c0, %c0_2, %c0_3, %c0_4] : memref<1x1x128x128xf32, #tpu.memory_space<vmem>>, vector<1x1x128x128xf32>
      tpu.vector_store %arg7[%c0, %c0_2, %c0_3, %c0_4], %12 {strides = array<i32>} : memref<1x1x128x128xf32, #tpu.memory_space<vmem>>, vector<1x1x128x128xf32>,
    } else {
    }
    %7 = arith.index_cast %1 : i32 to index
    %8 = memref.load %arg5[%7] : memref<4xi32, #tpu.memory_space<smem>>
    %c1_i32_0 = arith.constant 1 : i32
    %9 = arith.cmpi eq, %8, %c1_i32_0 : i32
    %10 = arith.extui %9 : i1 to i32
    %c0_i32_1 = arith.constant 0 : i32
    %11 = arith.cmpi ne, %10, %c0_i32_1 : i32
    scf.if %11 {
      %c0 = arith.constant 0 : index
      %c0_2 = arith.constant 0 : index
      %12 = vector.load %arg6[%c0, %c0_2] : memref<128x128xf32, #tpu.memory_space<vmem>>, vector<128x128xf32>
      %cst = arith.constant dense<0.000000e+00> : vector<128x128xf32>
      %13 = tpu.matmul %12, %12, %cst {dimension_numbers = #tpu.dot_dimension_numbers<[1], [1], [0], [0], [0, 0, 1, 0], [], []>} : vector<128x128xf32>, vector<128x128xf32>, vector<128x128xf32> -> vector<128x128xf32>
      %c0_3 = arith.constant 0 : index
      %c0_4 = arith.constant 0 : index
      %c0_5 = arith.constant 0 : index
      %c0_6 = arith.constant 0 : index
      %14 = vector.load %arg7[%c0_3, %c0_4, %c0_5, %c0_6] : memref<1x1x128x128xf32, #tpu.memory_space<vmem>>, vector<1x1x128x128xf32>
      %15 = vector.shape_cast %13 : vector<128x128xf32> to vector<1x1x128x128xf32>
      %16 = arith.addf %14, %15 : vector<1x1x128x128xf32>
      %c0_7 = arith.constant 0 : index
      %c0_8 = arith.constant 0 : index
      %c0_9 = arith.constant 0 : index
      %c0_10 = arith.constant 0 : index
      %17 = vector.load %arg7[%c0_7, %c0_8, %c0_9, %c0_10] : memref<1x1x128x128xf32, #tpu.memory_space<vmem>>, vector<1x1x128x128xf32>
      tpu.vector_store %arg7[%c0_7, %c0_8, %c0_9, %c0_10], %16 {strides = array<i32>} : memref<1x1x128x128xf32, #tpu.memory_space<vmem>>, vector<1x1x128x128xf32>,
    } else {
    }
    return
  }
  func.func @transform_0(%arg0: i32, %arg1: i32, %arg2: memref<4xi32, #tpu.memory_space<smem>>, %arg3: memref<4xi32, #tpu.memory_space<smem>>, %arg4: memref<4xi32, #tpu.memory_space<smem>>, %arg5: memref<4xi32, #tpu.memory_space<smem>>) -> (i32, i32) {
    %c2_i32 = arith.constant 2 : i32
    %0 = arith.muli %arg0, %c2_i32 : i32
    %1 = arith.addi %0, %arg1 : i32
    %2 = arith.index_cast %1 : i32 to index
    %3 = memref.load %arg3[%2] : memref<4xi32, #tpu.memory_space<smem>>
    %c0_i32 = arith.constant 0 : i32
    %c0_i32_0 = arith.constant 0 : i32
    return %c0_i32, %3 : i32, i32
  }
  func.func @transform_1(%arg0: i32, %arg1: i32, %arg2: memref<4xi32, #tpu.memory_space<smem>>, %arg3: memref<4xi32, #tpu.memory_space<smem>>, %arg4: memref<4xi32, #tpu.memory_space<smem>>, %arg5: memref<4xi32, #tpu.memory_space<smem>>) -> (i32, i32, i32, i32) {
    %c2_i32 = arith.constant 2 : i32
    %0 = arith.muli %arg0, %c2_i32 : i32
    %1 = arith.addi %0, %arg1 : i32
    %2 = arith.index_cast %1 : i32 to index
    %3 = memref.load %arg2[%2] : memref<4xi32, #tpu.memory_space<smem>>
    %c0_i32 = arith.constant 0 : i32
    %c0_i32_0 = arith.constant 0 : i32
    %c0_i32_1 = arith.constant 0 : i32
    return %arg0, %3, %c0_i32, %c0_i32_0 : i32, i32, i32, i32
  }
}

</mosaic_0001>

<bundles_post_ra>
// kernel: squeeze.24
= control target key start
LH: loop header
LB: loop body
LE: loop exit
PB: predicated region body
PF: predicated region fallthrough
CT: control target
= control target key end

     0   :  { %s1493_s10 = smov 112   ;;  %s1495_s11 = smov 80   ;;  %vm3_vm0 = vcmask 130048   ;;  %s2838_s0 = inlined_call_operand.vmem [shape: f32[1,128,128], index: 0, kind: input, shape index: {}]   ;;  %s2839_s1 = inlined_call_operand.vmem [shape: f32[8,16,8,16], index: 1, kind: output, shape index: {}]  }
   0x1   :  { %v1513_v0 = vld [vmem:[%s2838_s0 + $0x10] sm:$0xff]   ;;  %v1518_v1 = vld [vmem:[%s2838_s0] sm:$0xff]   ;;  %v1525_v2 = vld [vmem:[%s2838_s0 + $0x18] sm:$0xff]   ;;  %s1496_s12 = smov 64   ;;  %s1497_s16 = smov 48  }
   0x2   :  { %130 = vrot.lane.b32.xlu1 %v1513_v0, %s1493_s10  ;;  %112 = vrot.lane.b32.xlu0 %v1518_v1, %s1493_s10  ;;  %v1530_v3 = vld [vmem:[%s2838_s0 + $0x8] sm:$0xff]   ;;  %v1542_v5 = vld [vmem:[%s2838_s0 + $0x20] sm:$0xff]   ;;  %s1498_s24 = smov 32   ;;  %s1499_s3 = smov 16  }
   0x3   :  { %v1537_v4 = vld [vmem:[%s2838_s0 + $0x28] sm:$0xff]   ;;  %v1549_v6 = vld [vmem:[%s2838_s0 + $0x38] sm:$0xff]   ;;  %v1554_v7 = vld [vmem:[%s2838_s0 + $0x30] sm:$0xff]  }
   0x4   :  { %v1561_v8 = vld [vmem:[%s2838_s0 + $0x48] sm:$0xff]   ;;  %v1566_v9 = vld [vmem:[%s2838_s0 + $0x40] sm:$0xff]   ;;  %v1573_v10 = vld [vmem:[%s2838_s0 + $0x58] sm:$0xff]  }
   0x5   :  { %v1578_v11 = vld [vmem:[%s2838_s0 + $0x50] sm:$0xff]   ;;  %v1585_v12 = vld [vmem:[%s2838_s0 + $0x68] sm:$0xff]   ;;  %v1590_v13 = vld [vmem:[%s2838_s0 + $0x60] sm:$0xff]  }
   0x6   :  { %139 = vrot.lane.b32.xlu1 %v1525_v2, %s1493_s10  ;;  %121 = vrot.lane.b32.xlu0 %v1530_v3, %s1493_s10  ;;  %v1597_v14 = vld [vmem:[%s2838_s0 + $0x78] sm:$0xff]   ;;  %v1602_v15 = vld [vmem:[%s2838_s0 + $0x70] sm:$0xff]  }
   0xa   :  { %157 = vrot.lane.b32.xlu1 %v1537_v4, %s1493_s10  ;;  %148 = vrot.lane.b32.xlu0 %v1542_v5, %s1493_s10 }
   0xe   :  { %175 = vrot.lane.b32.xlu1 %v1549_v6, %s1493_s10  ;;  %166 = vrot.lane.b32.xlu0 %v1554_v7, %s1493_s10 }
  0x12   :  { %193 = vrot.lane.b32.xlu1 %v1561_v8, %s1493_s10  ;;  %184 = vrot.lane.b32.xlu0 %v1566_v9, %s1493_s10 }
  0x16   :  { %211 = vrot.lane.b32.xlu1 %v1573_v10, %s1493_s10  ;;  %202 = vrot.lane.b32.xlu0 %v1578_v11, %s1493_s10 }
  0x1a   :  { %229 = vrot.lane.b32.xlu1 %v1585_v12, %s1493_s10  ;;  %220 = vrot.lane.b32.xlu0 %v1590_v13, %s1493_s10 }
  0x1e   :  { %247 = vrot.lane.b32.xlu1 %v1597_v14, %s1493_s10  ;;  %238 = vrot.lane.b32.xlu0 %v1602_v15, %s1493_s10  ;;  %s1494_s10 = smov 96  }
  0x22   :  { %264 = vrot.lane.b32.xlu1 %v1530_v3, %s1494_s10  ;;  %255 = vrot.lane.b32.xlu0 %v1518_v1, %s1494_s10 }
  0x26   :  { %282 = vrot.lane.b32.xlu1 %v1525_v2, %s1494_s10  ;;  %273 = vrot.lane.b32.xlu0 %v1513_v0, %s1494_s10 }
  0x2a   :  { %300 = vrot.lane.b32.xlu1 %v1537_v4, %s1494_s10  ;;  %291 = vrot.lane.b32.xlu0 %v1542_v5, %s1494_s10 }
  0x2e   :  { %318 = vrot.lane.b32.xlu1 %v1549_v6, %s1494_s10  ;;  %309 = vrot.lane.b32.xlu0 %v1554_v7, %s1494_s10 }
  0x32   :  { %336 = vrot.lane.b32.xlu1 %v1561_v8, %s1494_s10  ;;  %327 = vrot.lane.b32.xlu0 %v1566_v9, %s1494_s10 }
  0x36   :  { %354 = vrot.lane.b32.xlu1 %v1573_v10, %s1494_s10  ;;  %345 = vrot.lane.b32.xlu0 %v1578_v11, %s1494_s10 }
  0x3a   :  { %372 = vrot.lane.b32.xlu1 %v1585_v12, %s1494_s10  ;;  %363 = vrot.lane.b32.xlu0 %v1590_v13, %s1494_s10 }
  0x3e   :  { %390 = vrot.lane.b32.xlu1 %v1597_v14, %s1494_s10  ;;  %381 = vrot.lane.b32.xlu0 %v1602_v15, %s1494_s10 }
  0x42   :  { %407 = vrot.lane.b32.xlu1 %v1530_v3, %s1495_s11  ;;  %398 = vrot.lane.b32.xlu0 %v1518_v1, %s1495_s11 }
  0x46   :  { %425 = vrot.lane.b32.xlu1 %v1525_v2, %s1495_s11  ;;  %416 = vrot.lane.b32.xlu0 %v1513_v0, %s1495_s11 }
  0x4a   :  { %443 = vrot.lane.b32.xlu1 %v1537_v4, %s1495_s11  ;;  %434 = vrot.lane.b32.xlu0 %v1542_v5, %s1495_s11 }
  0x4e   :  { %461 = vrot.lane.b32.xlu1 %v1549_v6, %s1495_s11  ;;  %452 = vrot.lane.b32.xlu0 %v1554_v7, %s1495_s11 }
  0x52   :  { %479 = vrot.lane.b32.xlu1 %v1561_v8, %s1495_s11  ;;  %470 = vrot.lane.b32.xlu0 %v1566_v9, %s1495_s11 }
  0x56   :  { %497 = vrot.lane.b32.xlu1 %v1573_v10, %s1495_s11  ;;  %488 = vrot.lane.b32.xlu0 %v1578_v11, %s1495_s11 }
  0x5a   :  { %515 = vrot.lane.b32.xlu1 %v1585_v12, %s1495_s11  ;;  %506 = vrot.lane.b32.xlu0 %v1590_v13, %s1495_s11 }
  0x5e   :  { %533 = vrot.lane.b32.xlu1 %v1597_v14, %s1495_s11  ;;  %524 = vrot.lane.b32.xlu0 %v1602_v15, %s1495_s11 }
  0x62   :  { %550 = vrot.lane.b32.xlu1 %v1530_v3, %s1496_s12  ;;  %541 = vrot.lane.b32.xlu0 %v1518_v1, %s1496_s12 }
  0x66   :  { %568 = vrot.lane.b32.xlu1 %v1525_v2, %s1496_s12  ;;  %559 = vrot.lane.b32.xlu0 %v1513_v0, %s1496_s12 }
  0x6a   :  { %586 = vrot.lane.b32.xlu1 %v1537_v4, %s1496_s12  ;;  %577 = vrot.lane.b32.xlu0 %v1542_v5, %s1496_s12 }
  0x6e   :  { %604 = vrot.lane.b32.xlu1 %v1549_v6, %s1496_s12  ;;  %595 = vrot.lane.b32.xlu0 %v1554_v7, %s1496_s12 }
  0x72   :  { %622 = vrot.lane.b32.xlu1 %v1561_v8, %s1496_s12  ;;  %613 = vrot.lane.b32.xlu0 %v1566_v9, %s1496_s12 }
  0x74   :  { %v131_v16 = vpop.permute.xlu1 %130   ;;  %v113_v17 = vpop.permute.xlu0 %112  }
  0x75   :  { %1163 = vst.msk [vmem:[%s2839_s1 + $0x81] ss:$8 sm:$0xf] %vm3_vm0, %v131_v16   ;;  %1164 = vst.msk [vmem:[%s2839_s1 + $0x81] ss:$8 sm:$0xf0] %vm3_vm0, %v131_v16  }
  0x76   :  { %1157 = vst.msk [vmem:[%s2839_s1 + $0x1] ss:$8 sm:$0xf] %vm3_vm0, %v113_v17   ;;  %1158 = vst.msk [vmem:[%s2839_s1 + $0x1] ss:$8 sm:$0xf0] %vm3_vm0, %v113_v17   ;;  %640 = vrot.lane.b32.xlu1 %v1573_v10, %s1496_s12  ;;  %631 = vrot.lane.b32.xlu0 %v1578_v11, %s1496_s12 }
  0x77   :  { %v1139_v16 = vld [vmem:[%s2838_s0 + $0x50] sm:$0xff]  }
  0x78   :  { %v140_v18 = vpop.permute.xlu1 %139   ;;  %v122_v19 = vpop.permute.xlu0 %121   ;;  %1140 = vst.msk [vmem:[%s2839_s1 + $0x280] ss:$8 sm:$0xf] %vm3_vm0, %v1139_v16   ;;  %1141 = vst.msk [vmem:[%s2839_s1 + $0x280] ss:$8 sm:$0xf0] %vm3_vm0, %v1139_v16  }
  0x79   :  { %1166 = vst.msk [vmem:[%s2839_s1 + $0xc1] ss:$8 sm:$0xf] %vm3_vm0, %v140_v18   ;;  %1167 = vst.msk [vmem:[%s2839_s1 + $0xc1] ss:$8 sm:$0xf0] %vm3_vm0, %v140_v18  }
  0x7a   :  { %1160 = vst.msk [vmem:[%s2839_s1 + $0x41] ss:$8 sm:$0xf] %vm3_vm0, %v122_v19   ;;  %1161 = vst.msk [vmem:[%s2839_s1 + $0x41] ss:$8 sm:$0xf0] %vm3_vm0, %v122_v19   ;;  %658 = vrot.lane.b32.xlu1 %v1585_v12, %s1496_s12  ;;  %649 = vrot.lane.b32.xlu0 %v1590_v13, %s1496_s12 }
  0x7b   :  { %v1142_v19 = vld [vmem:[%s2838_s0 + $0x58] sm:$0xff]  }
  0x7c   :  { %v158_v20 = vpop.permute.xlu1 %157   ;;  %v149_v21 = vpop.permute.xlu0 %148   ;;  %1143 = vst.msk [vmem:[%s2839_s1 + $0x2c0] ss:$8 sm:$0xf] %vm3_vm0, %v1142_v19   ;;  %1144 = vst.msk [vmem:[%s2839_s1 + $0x2c0] ss:$8 sm:$0xf0] %vm3_vm0, %v1142_v19  }
  0x7d   :  { %1172 = vst.msk [vmem:[%s2839_s1 + $0x141] ss:$8 sm:$0xf] %vm3_vm0, %v158_v20   ;;  %1173 = vst.msk [vmem:[%s2839_s1 + $0x141] ss:$8 sm:$0xf0] %vm3_vm0, %v158_v20  }
  0x7e   :  { %1169 = vst.msk [vmem:[%s2839_s1 + $0x101] ss:$8 sm:$0xf] %vm3_vm0, %v149_v21   ;;  %1170 = vst.msk [vmem:[%s2839_s1 + $0x101] ss:$8 sm:$0xf0] %vm3_vm0, %v149_v21   ;;  %676 = vrot.lane.b32.xlu1 %v1597_v14, %s1496_s12  ;;  %667 = vrot.lane.b32.xlu0 %v1602_v15, %s1496_s12 }
  0x7f   :  { %v1145_v20 = vld [vmem:[%s2838_s0 + $0x60] sm:$0xff]   ;;  %v1148_v21 = vld [vmem:[%s2838_s0 + $0x68] sm:$0xff]  }
  0x80   :  { %v176_v22 = vpop.permute.xlu1 %175   ;;  %v167_v23 = vpop.permute.xlu0 %166   ;;  %1146 = vst.msk [vmem:[%s2839_s1 + $0x300] ss:$8 sm:$0xf] %vm3_vm0, %v1145_v20   ;;  %1147 = vst.msk [vmem:[%s2839_s1 + $0x300] ss:$8 sm:$0xf0] %vm3_vm0, %v1145_v20  }
  0x81   :  { %1178 = vst.msk [vmem:[%s2839_s1 + $0x1c1] ss:$8 sm:$0xf] %vm3_vm0, %v176_v22   ;;  %1179 = vst.msk [vmem:[%s2839_s1 + $0x1c1] ss:$8 sm:$0xf0] %vm3_vm0, %v176_v22  }
  0x82   :  { %1175 = vst.msk [vmem:[%s2839_s1 + $0x181] ss:$8 sm:$0xf] %vm3_vm0, %v167_v23   ;;  %1176 = vst.msk [vmem:[%s2839_s1 + $0x181] ss:$8 sm:$0xf0] %vm3_vm0, %v167_v23   ;;  %693 = vrot.lane.b32.xlu1 %v1530_v3, %s1497_s16  ;;  %684 = vrot.lane.b32.xlu0 %v1518_v1, %s1497_s16 }
  0x83   :  { %1149 = vst.msk [vmem:[%s2839_s1 + $0x340] ss:$8 sm:$0xf] %vm3_vm0, %v1148_v21   ;;  %1150 = vst.msk [vmem:[%s2839_s1 + $0x340] ss:$8 sm:$0xf0] %vm3_vm0, %v1148_v21  }
  0x84   :  { %v194_v24 = vpop.permute.xlu1 %193   ;;  %v185_v25 = vpop.permute.xlu0 %184   ;;  %v1151_v22 = vld [vmem:[%s2838_s0 + $0x70] sm:$0xff]   ;;  %v1154_v23 = vld [vmem:[%s2838_s0 + $0x78] sm:$0xff]  }
  0x85   :  { %1184 = vst.msk [vmem:[%s2839_s1 + $0x241] ss:$8 sm:$0xf] %vm3_vm0, %v194_v24   ;;  %1185 = vst.msk [vmem:[%s2839_s1 + $0x241] ss:$8 sm:$0xf0] %vm3_vm0, %v194_v24  }
  0x86   :  { %1181 = vst.msk [vmem:[%s2839_s1 + $0x201] ss:$8 sm:$0xf] %vm3_vm0, %v185_v25   ;;  %1182 = vst.msk [vmem:[%s2839_s1 + $0x201] ss:$8 sm:$0xf0] %vm3_vm0, %v185_v25   ;;  %711 = vrot.lane.b32.xlu1 %v1525_v2, %s1497_s16  ;;  %702 = vrot.lane.b32.xlu0 %v1513_v0, %s1497_s16 }
  0x87   :  { %1152 = vst.msk [vmem:[%s2839_s1 + $0x380] ss:$8 sm:$0xf] %vm3_vm0, %v1151_v22   ;;  %1153 = vst.msk [vmem:[%s2839_s1 + $0x380] ss:$8 sm:$0xf0] %vm3_vm0, %v1151_v22  }
  0x88   :  { %v212_v26 = vpop.permute.xlu1 %211   ;;  %v203_v27 = vpop.permute.xlu0 %202   ;;  %1155 = vst.msk [vmem:[%s2839_s1 + $0x3c0] ss:$8 sm:$0xf] %vm3_vm0, %v1154_v23   ;;  %1156 = vst.msk [vmem:[%s2839_s1 + $0x3c0] ss:$8 sm:$0xf0] %vm3_vm0, %v1154_v23  }
  0x89   :  { %1190 = vst.msk [vmem:[%s2839_s1 + $0x2c1] ss:$8 sm:$0xf] %vm3_vm0, %v212_v26   ;;  %1191 = vst.msk [vmem:[%s2839_s1 + $0x2c1] ss:$8 sm:$0xf0] %vm3_vm0, %v212_v26  }
  0x8a   :  { %1187 = vst.msk [vmem:[%s2839_s1 + $0x281] ss:$8 sm:$0xf] %vm3_vm0, %v203_v27   ;;  %1188 = vst.msk [vmem:[%s2839_s1 + $0x281] ss:$8 sm:$0xf0] %vm3_vm0, %v203_v27   ;;  %729 = vrot.lane.b32.xlu1 %v1537_v4, %s1497_s16  ;;  %720 = vrot.lane.b32.xlu0 %v1542_v5, %s1497_s16 }
  0x8c   :  { %v230_v28 = vpop.permute.xlu1 %229   ;;  %v221_v29 = vpop.permute.xlu0 %220  }
  0x8d   :  { %1196 = vst.msk [vmem:[%s2839_s1 + $0x341] ss:$8 sm:$0xf] %vm3_vm0, %v230_v28   ;;  %1197 = vst.msk [vmem:[%s2839_s1 + $0x341] ss:$8 sm:$0xf0] %vm3_vm0, %v230_v28  }
  0x8e   :  { %1193 = vst.msk [vmem:[%s2839_s1 + $0x301] ss:$8 sm:$0xf] %vm3_vm0, %v221_v29   ;;  %1194 = vst.msk [vmem:[%s2839_s1 + $0x301] ss:$8 sm:$0xf0] %vm3_vm0, %v221_v29   ;;  %747 = vrot.lane.b32.xlu1 %v1549_v6, %s1497_s16  ;;  %738 = vrot.lane.b32.xlu0 %v1554_v7, %s1497_s16 }
  0x90   :  { %v248_v30 = vpop.permute.xlu1 %247   ;;  %v239_v31 = vpop.permute.xlu0 %238  }
  0x91   :  { %1202 = vst.msk [vmem:[%s2839_s1 + $0x3c1] ss:$8 sm:$0xf] %vm3_vm0, %v248_v30   ;;  %1203 = vst.msk [vmem:[%s2839_s1 + $0x3c1] ss:$8 sm:$0xf0] %vm3_vm0, %v248_v30  }
  0x92   :  { %1199 = vst.msk [vmem:[%s2839_s1 + $0x381] ss:$8 sm:$0xf] %vm3_vm0, %v239_v31   ;;  %1200 = vst.msk [vmem:[%s2839_s1 + $0x381] ss:$8 sm:$0xf0] %vm3_vm0, %v239_v31   ;;  %765 = vrot.lane.b32.xlu1 %v1561_v8, %s1497_s16  ;;  %756 = vrot.lane.b32.xlu0 %v1566_v9, %s1497_s16 }
  0x94   :  { %v265_v32 = vpop.permute.xlu1 %264   ;;  %v256_v33 = vpop.permute.xlu0 %255  }
  0x95   :  { %1207 = vst.msk [vmem:[%s2839_s1 + $0x42] ss:$8 sm:$0xf] %vm3_vm0, %v265_v32   ;;  %1208 = vst.msk [vmem:[%s2839_s1 + $0x42] ss:$8 sm:$0xf0] %vm3_vm0, %v265_v32  }
  0x96   :  { %1204 = vst.msk [vmem:[%s2839_s1 + $0x2] ss:$8 sm:$0xf] %vm3_vm0, %v256_v33   ;;  %1205 = vst.msk [vmem:[%s2839_s1 + $0x2] ss:$8 sm:$0xf0] %vm3_vm0, %v256_v33   ;;  %783 = vrot.lane.b32.xlu1 %v1573_v10, %s1497_s16  ;;  %774 = vrot.lane.b32.xlu0 %v1578_v11, %s1497_s16 }
  0x98   :  { %v283_v34 = vpop.permute.xlu1 %282   ;;  %v274_v35 = vpop.permute.xlu0 %273  }
  0x99   :  { %1213 = vst.msk [vmem:[%s2839_s1 + $0xc2] ss:$8 sm:$0xf] %vm3_vm0, %v283_v34   ;;  %1214 = vst.msk [vmem:[%s2839_s1 + $0xc2] ss:$8 sm:$0xf0] %vm3_vm0, %v283_v34  }
  0x9a   :  { %1210 = vst.msk [vmem:[%s2839_s1 + $0x82] ss:$8 sm:$0xf] %vm3_vm0, %v274_v35   ;;  %1211 = vst.msk [vmem:[%s2839_s1 + $0x82] ss:$8 sm:$0xf0] %vm3_vm0, %v274_v35   ;;  %801 = vrot.lane.b32.xlu1 %v1585_v12, %s1497_s16  ;;  %792 = vrot.lane.b32.xlu0 %v1590_v13, %s1497_s16 }
  0x9c   :  { %v301_v36 = vpop.permute.xlu1 %300   ;;  %v292_v37 = vpop.permute.xlu0 %291  }
  0x9d   :  { %1219 = vst.msk [vmem:[%s2839_s1 + $0x142] ss:$8 sm:$0xf] %vm3_vm0, %v301_v36   ;;  %1220 = vst.msk [vmem:[%s2839_s1 + $0x142] ss:$8 sm:$0xf0] %vm3_vm0, %v301_v36  }
  0x9e   :  { %1216 = vst.msk [vmem:[%s2839_s1 + $0x102] ss:$8 sm:$0xf] %vm3_vm0, %v292_v37   ;;  %1217 = vst.msk [vmem:[%s2839_s1 + $0x102] ss:$8 sm:$0xf0] %vm3_vm0, %v292_v37   ;;  %819 = vrot.lane.b32.xlu1 %v1597_v14, %s1497_s16  ;;  %810 = vrot.lane.b32.xlu0 %v1602_v15, %s1497_s16 }
  0xa0   :  { %v319_v38 = vpop.permute.xlu1 %318   ;;  %v310_v39 = vpop.permute.xlu0 %309  }
  0xa1   :  { %1225 = vst.msk [vmem:[%s2839_s1 + $0x1c2] ss:$8 sm:$0xf] %vm3_vm0, %v319_v38   ;;  %1226 = vst.msk [vmem:[%s2839_s1 + $0x1c2] ss:$8 sm:$0xf0] %vm3_vm0, %v319_v38  }
  0xa2   :  { %1222 = vst.msk [vmem:[%s2839_s1 + $0x182] ss:$8 sm:$0xf] %vm3_vm0, %v310_v39   ;;  %1223 = vst.msk [vmem:[%s2839_s1 + $0x182] ss:$8 sm:$0xf0] %vm3_vm0, %v310_v39   ;;  %836 = vrot.lane.b32.xlu1 %v1530_v3, %s1498_s24  ;;  %827 = vrot.lane.b32.xlu0 %v1518_v1, %s1498_s24 }
  0xa4   :  { %v337_v40 = vpop.permute.xlu1 %336   ;;  %v328_v41 = vpop.permute.xlu0 %327  }
  0xa5   :  { %1231 = vst.msk [vmem:[%s2839_s1 + $0x242] ss:$8 sm:$0xf] %vm3_vm0, %v337_v40   ;;  %1232 = vst.msk [vmem:[%s2839_s1 + $0x242] ss:$8 sm:$0xf0] %vm3_vm0, %v337_v40  }
  0xa6   :  { %1228 = vst.msk [vmem:[%s2839_s1 + $0x202] ss:$8 sm:$0xf] %vm3_vm0, %v328_v41   ;;  %1229 = vst.msk [vmem:[%s2839_s1 + $0x202] ss:$8 sm:$0xf0] %vm3_vm0, %v328_v41   ;;  %854 = vrot.lane.b32.xlu1 %v1525_v2, %s1498_s24  ;;  %845 = vrot.lane.b32.xlu0 %v1513_v0, %s1498_s24 }
  0xa8   :  { %v355_v42 = vpop.permute.xlu1 %354   ;;  %v346_v43 = vpop.permute.xlu0 %345  }
  0xa9   :  { %1237 = vst.msk [vmem:[%s2839_s1 + $0x2c2] ss:$8 sm:$0xf] %vm3_vm0, %v355_v42   ;;  %1238 = vst.msk [vmem:[%s2839_s1 + $0x2c2] ss:$8 sm:$0xf0] %vm3_vm0, %v355_v42  }
  0xaa   :  { %1234 = vst.msk [vmem:[%s2839_s1 + $0x282] ss:$8 sm:$0xf] %vm3_vm0, %v346_v43   ;;  %1235 = vst.msk [vmem:[%s2839_s1 + $0x282] ss:$8 sm:$0xf0] %vm3_vm0, %v346_v43   ;;  %872 = vrot.lane.b32.xlu1 %v1537_v4, %s1498_s24  ;;  %863 = vrot.lane.b32.xlu0 %v1542_v5, %s1498_s24 }
  0xac   :  { %v373_v44 = vpop.permute.xlu1 %372   ;;  %v364_v45 = vpop.permute.xlu0 %363  }
  0xad   :  { %1243 = vst.msk [vmem:[%s2839_s1 + $0x342] ss:$8 sm:$0xf] %vm3_vm0, %v373_v44   ;;  %1244 = vst.msk [vmem:[%s2839_s1 + $0x342] ss:$8 sm:$0xf0] %vm3_vm0, %v373_v44  }
  0xae   :  { %1240 = vst.msk [vmem:[%s2839_s1 + $0x302] ss:$8 sm:$0xf] %vm3_vm0, %v364_v45   ;;  %1241 = vst.msk [vmem:[%s2839_s1 + $0x302] ss:$8 sm:$0xf0] %vm3_vm0, %v364_v45   ;;  %890 = vrot.lane.b32.xlu1 %v1549_v6, %s1498_s24  ;;  %881 = vrot.lane.b32.xlu0 %v1554_v7, %s1498_s24 }
  0xb0   :  { %v391_v46 = vpop.permute.xlu1 %390   ;;  %v382_v47 = vpop.permute.xlu0 %381  }
  0xb1   :  { %1249 = vst.msk [vmem:[%s2839_s1 + $0x3c2] ss:$8 sm:$0xf] %vm3_vm0, %v391_v46   ;;  %1250 = vst.msk [vmem:[%s2839_s1 + $0x3c2] ss:$8 sm:$0xf0] %vm3_vm0, %v391_v46  }
  0xb2   :  { %1246 = vst.msk [vmem:[%s2839_s1 + $0x382] ss:$8 sm:$0xf] %vm3_vm0, %v382_v47   ;;  %1247 = vst.msk [vmem:[%s2839_s1 + $0x382] ss:$8 sm:$0xf0] %vm3_vm0, %v382_v47   ;;  %908 = vrot.lane.b32.xlu1 %v1561_v8, %s1498_s24  ;;  %899 = vrot.lane.b32.xlu0 %v1566_v9, %s1498_s24 }
  0xb4   :  { %v408_v48 = vpop.permute.xlu1 %407   ;;  %v399_v49 = vpop.permute.xlu0 %398  }
  0xb5   :  { %1254 = vst.msk [vmem:[%s2839_s1 + $0x43] ss:$8 sm:$0xf] %vm3_vm0, %v408_v48   ;;  %1255 = vst.msk [vmem:[%s2839_s1 + $0x43] ss:$8 sm:$0xf0] %vm3_vm0, %v408_v48  }
  0xb6   :  { %1251 = vst.msk [vmem:[%s2839_s1 + $0x3] ss:$8 sm:$0xf] %vm3_vm0, %v399_v49   ;;  %1252 = vst.msk [vmem:[%s2839_s1 + $0x3] ss:$8 sm:$0xf0] %vm3_vm0, %v399_v49   ;;  %926 = vrot.lane.b32.xlu1 %v1573_v10, %s1498_s24  ;;  %917 = vrot.lane.b32.xlu0 %v1578_v11, %s1498_s24 }
  0xb8   :  { %v426_v50 = vpop.permute.xlu1 %425   ;;  %v417_v51 = vpop.permute.xlu0 %416  }
  0xb9   :  { %1260 = vst.msk [vmem:[%s2839_s1 + $0xc3] ss:$8 sm:$0xf] %vm3_vm0, %v426_v50   ;;  %1261 = vst.msk [vmem:[%s2839_s1 + $0xc3] ss:$8 sm:$0xf0] %vm3_vm0, %v426_v50  }
  0xba   :  { %1257 = vst.msk [vmem:[%s2839_s1 + $0x83] ss:$8 sm:$0xf] %vm3_vm0, %v417_v51   ;;  %1258 = vst.msk [vmem:[%s2839_s1 + $0x83] ss:$8 sm:$0xf0] %vm3_vm0, %v417_v51   ;;  %944 = vrot.lane.b32.xlu1 %v1585_v12, %s1498_s24  ;;  %935 = vrot.lane.b32.xlu0 %v1590_v13, %s1498_s24 }
  0xbc   :  { %v444_v52 = vpop.permute.xlu1 %443   ;;  %v435_v53 = vpop.permute.xlu0 %434  }
  0xbd   :  { %1266 = vst.msk [vmem:[%s2839_s1 + $0x143] ss:$8 sm:$0xf] %vm3_vm0, %v444_v52   ;;  %1267 = vst.msk [vmem:[%s2839_s1 + $0x143] ss:$8 sm:$0xf0] %vm3_vm0, %v444_v52  }
  0xbe   :  { %1263 = vst.msk [vmem:[%s2839_s1 + $0x103] ss:$8 sm:$0xf] %vm3_vm0, %v435_v53   ;;  %1264 = vst.msk [vmem:[%s2839_s1 + $0x103] ss:$8 sm:$0xf0] %vm3_vm0, %v435_v53   ;;  %962 = vrot.lane.b32.xlu1 %v1597_v14, %s1498_s24  ;;  %953 = vrot.lane.b32.xlu0 %v1602_v15, %s1498_s24 }
  0xc0   :  { %v462_v54 = vpop.permute.xlu1 %461   ;;  %v453_v55 = vpop.permute.xlu0 %452  }
  0xc1   :  { %1272 = vst.msk [vmem:[%s2839_s1 + $0x1c3] ss:$8 sm:$0xf] %vm3_vm0, %v462_v54   ;;  %1273 = vst.msk [vmem:[%s2839_s1 + $0x1c3] ss:$8 sm:$0xf0] %vm3_vm0, %v462_v54  }
  0xc2   :  { %1269 = vst.msk [vmem:[%s2839_s1 + $0x183] ss:$8 sm:$0xf] %vm3_vm0, %v453_v55   ;;  %1270 = vst.msk [vmem:[%s2839_s1 + $0x183] ss:$8 sm:$0xf0] %vm3_vm0, %v453_v55   ;;  %979 = vrot.lane.b32.xlu1 %v1530_v3, %s1499_s3  ;;  %970 = vrot.lane.b32.xlu0 %v1518_v1, %s1499_s3 }
  0xc3   :  { %v1112_v1 = vld [vmem:[%s2838_s0 + $0x8] sm:$0xff]   ;;  %v1118_v3 = vld [vmem:[%s2838_s0 + $0x18] sm:$0xff]  }
  0xc4   :  { %v480_v56 = vpop.permute.xlu1 %479   ;;  %v471_v57 = vpop.permute.xlu0 %470   ;;  %1113 = vst.msk [vmem:[%s2839_s1 + $0x40] ss:$8 sm:$0xf] %vm3_vm0, %v1112_v1   ;;  %1114 = vst.msk [vmem:[%s2839_s1 + $0x40] ss:$8 sm:$0xf0] %vm3_vm0, %v1112_v1  }
  0xc5   :  { %1278 = vst.msk [vmem:[%s2839_s1 + $0x243] ss:$8 sm:$0xf] %vm3_vm0, %v480_v56   ;;  %1279 = vst.msk [vmem:[%s2839_s1 + $0x243] ss:$8 sm:$0xf0] %vm3_vm0, %v480_v56  }
  0xc6   :  { %1275 = vst.msk [vmem:[%s2839_s1 + $0x203] ss:$8 sm:$0xf] %vm3_vm0, %v471_v57   ;;  %1276 = vst.msk [vmem:[%s2839_s1 + $0x203] ss:$8 sm:$0xf0] %vm3_vm0, %v471_v57   ;;  %997 = vrot.lane.b32.xlu1 %v1525_v2, %s1499_s3  ;;  %988 = vrot.lane.b32.xlu0 %v1513_v0, %s1499_s3 }
  0xc7   :  { %v2_v0 = vld [vmem:[%s2838_s0] sm:$0xff]   ;;  %v1115_v2 = vld [vmem:[%s2838_s0 + $0x10] sm:$0xff]   ;;  %1119 = vst.msk [vmem:[%s2839_s1 + $0xc0] ss:$8 sm:$0xf] %vm3_vm0, %v1118_v3  }
  0xc8   :  { %v498_v58 = vpop.permute.xlu1 %497   ;;  %v489_v59 = vpop.permute.xlu0 %488   ;;  %4 = vst.msk [vmem:[%s2839_s1] ss:$8 sm:$0xf] %vm3_vm0, %v2_v0   ;;  %5 = vst.msk [vmem:[%s2839_s1] ss:$8 sm:$0xf0] %vm3_vm0, %v2_v0  }
  0xc9   :  { %1284 = vst.msk [vmem:[%s2839_s1 + $0x2c3] ss:$8 sm:$0xf] %vm3_vm0, %v498_v58   ;;  %1285 = vst.msk [vmem:[%s2839_s1 + $0x2c3] ss:$8 sm:$0xf0] %vm3_vm0, %v498_v58  }
  0xca   :  { %1281 = vst.msk [vmem:[%s2839_s1 + $0x283] ss:$8 sm:$0xf] %vm3_vm0, %v489_v59   ;;  %1282 = vst.msk [vmem:[%s2839_s1 + $0x283] ss:$8 sm:$0xf0] %vm3_vm0, %v489_v59   ;;  %1015 = vrot.lane.b32.xlu1 %v1537_v4, %s1499_s3  ;;  %1006 = vrot.lane.b32.xlu0 %v1542_v5, %s1499_s3 }
  0xcb   :  { %1116 = vst.msk [vmem:[%s2839_s1 + $0x80] ss:$8 sm:$0xf] %vm3_vm0, %v1115_v2   ;;  %1117 = vst.msk [vmem:[%s2839_s1 + $0x80] ss:$8 sm:$0xf0] %vm3_vm0, %v1115_v2  }
  0xcc   :  { %v516_v60 = vpop.permute.xlu1 %515   ;;  %v507_v61 = vpop.permute.xlu0 %506   ;;  %v1121_v4 = vld [vmem:[%s2838_s0 + $0x20] sm:$0xff]   ;;  %v1124_v5 = vld [vmem:[%s2838_s0 + $0x28] sm:$0xff]   ;;  %1120 = vst.msk [vmem:[%s2839_s1 + $0xc0] ss:$8 sm:$0xf0] %vm3_vm0, %v1118_v3  }
  0xcd   :  { %1290 = vst.msk [vmem:[%s2839_s1 + $0x343] ss:$8 sm:$0xf] %vm3_vm0, %v516_v60   ;;  %1291 = vst.msk [vmem:[%s2839_s1 + $0x343] ss:$8 sm:$0xf0] %vm3_vm0, %v516_v60  }
  0xce   :  { %1287 = vst.msk [vmem:[%s2839_s1 + $0x303] ss:$8 sm:$0xf] %vm3_vm0, %v507_v61   ;;  %1288 = vst.msk [vmem:[%s2839_s1 + $0x303] ss:$8 sm:$0xf0] %vm3_vm0, %v507_v61   ;;  %1033 = vrot.lane.b32.xlu1 %v1549_v6, %s1499_s3  ;;  %1024 = vrot.lane.b32.xlu0 %v1554_v7, %s1499_s3 }
  0xcf   :  { %1122 = vst.msk [vmem:[%s2839_s1 + $0x100] ss:$8 sm:$0xf] %vm3_vm0, %v1121_v4   ;;  %1123 = vst.msk [vmem:[%s2839_s1 + $0x100] ss:$8 sm:$0xf0] %vm3_vm0, %v1121_v4  }
  0xd0   :  { %v534_v62 = vpop.permute.xlu1 %533   ;;  %v525_v63 = vpop.permute.xlu0 %524   ;;  %1125 = vst.msk [vmem:[%s2839_s1 + $0x140] ss:$8 sm:$0xf] %vm3_vm0, %v1124_v5   ;;  %1126 = vst.msk [vmem:[%s2839_s1 + $0x140] ss:$8 sm:$0xf0] %vm3_vm0, %v1124_v5  }
  0xd1   :  { %1296 = vst.msk [vmem:[%s2839_s1 + $0x3c3] ss:$8 sm:$0xf] %vm3_vm0, %v534_v62   ;;  %1297 = vst.msk [vmem:[%s2839_s1 + $0x3c3] ss:$8 sm:$0xf0] %vm3_vm0, %v534_v62  }
  0xd2   :  { %1293 = vst.msk [vmem:[%s2839_s1 + $0x383] ss:$8 sm:$0xf] %vm3_vm0, %v525_v63   ;;  %1294 = vst.msk [vmem:[%s2839_s1 + $0x383] ss:$8 sm:$0xf0] %vm3_vm0, %v525_v63   ;;  %1051 = vrot.lane.b32.xlu1 %v1561_v8, %s1499_s3  ;;  %1042 = vrot.lane.b32.xlu0 %v1566_v9, %s1499_s3 }
  0xd3   :  { %v1127_v6 = vld [vmem:[%s2838_s0 + $0x30] sm:$0xff]   ;;  %v1130_v7 = vld [vmem:[%s2838_s0 + $0x38] sm:$0xff]   ;;  %v1133_v8 = vld [vmem:[%s2838_s0 + $0x40] sm:$0xff]  }
  0xd4   :  { %1128 = vst.msk [vmem:[%s2839_s1 + $0x180] ss:$8 sm:$0xf] %vm3_vm0, %v1127_v6   ;;  %1129 = vst.msk [vmem:[%s2839_s1 + $0x180] ss:$8 sm:$0xf0] %vm3_vm0, %v1127_v6   ;;  %v551_v17 = vpop.permute.xlu1 %550   ;;  %v542_v18 = vpop.permute.xlu0 %541  }
  0xd5   :  { %1131 = vst.msk [vmem:[%s2839_s1 + $0x1c0] ss:$8 sm:$0xf] %vm3_vm0, %v1130_v7   ;;  %1132 = vst.msk [vmem:[%s2839_s1 + $0x1c0] ss:$8 sm:$0xf0] %vm3_vm0, %v1130_v7  }
  0xd6   :  { %v1136_v9 = vld [vmem:[%s2838_s0 + $0x48] sm:$0xff]   ;;  %1134 = vst.msk [vmem:[%s2839_s1 + $0x200] ss:$8 sm:$0xf] %vm3_vm0, %v1133_v8   ;;  %1069 = vrot.lane.b32.xlu1 %v1573_v10, %s1499_s3  ;;  %1060 = vrot.lane.b32.xlu0 %v1578_v11, %s1499_s3 }
  0xd7   :  { %1135 = vst.msk [vmem:[%s2839_s1 + $0x200] ss:$8 sm:$0xf0] %vm3_vm0, %v1133_v8   ;;  %1137 = vst.msk [vmem:[%s2839_s1 + $0x240] ss:$8 sm:$0xf] %vm3_vm0, %v1136_v9  }
  0xd8   :  { %1138 = vst.msk [vmem:[%s2839_s1 + $0x240] ss:$8 sm:$0xf0] %vm3_vm0, %v1136_v9   ;;  %1301 = vst.msk [vmem:[%s2839_s1 + $0x44] ss:$8 sm:$0xf] %vm3_vm0, %v551_v17   ;;  %v569_v10 = vpop.permute.xlu1 %568   ;;  %v560_v11 = vpop.permute.xlu0 %559  }
  0xd9   :  { %1302 = vst.msk [vmem:[%s2839_s1 + $0x44] ss:$8 sm:$0xf0] %vm3_vm0, %v551_v17   ;;  %1298 = vst.msk [vmem:[%s2839_s1 + $0x4] ss:$8 sm:$0xf] %vm3_vm0, %v542_v18  }
  0xda   :  { %1299 = vst.msk [vmem:[%s2839_s1 + $0x4] ss:$8 sm:$0xf0] %vm3_vm0, %v542_v18   ;;  %1307 = vst.msk [vmem:[%s2839_s1 + $0xc4] ss:$8 sm:$0xf] %vm3_vm0, %v569_v10   ;;  %1087 = vrot.lane.b32.xlu1 %v1585_v12, %s1499_s3  ;;  %1078 = vrot.lane.b32.xlu0 %v1590_v13, %s1499_s3 }
  0xdb   :  { %1308 = vst.msk [vmem:[%s2839_s1 + $0xc4] ss:$8 sm:$0xf0] %vm3_vm0, %v569_v10   ;;  %1304 = vst.msk [vmem:[%s2839_s1 + $0x84] ss:$8 sm:$0xf] %vm3_vm0, %v560_v11  }
  0xdc   :  { %1305 = vst.msk [vmem:[%s2839_s1 + $0x84] ss:$8 sm:$0xf0] %vm3_vm0, %v560_v11   ;;  %v587_v12 = vpop.permute.xlu1 %586   ;;  %v578_v13 = vpop.permute.xlu0 %577  }
  0xdd   :  { %1313 = vst.msk [vmem:[%s2839_s1 + $0x144] ss:$8 sm:$0xf] %vm3_vm0, %v587_v12   ;;  %1314 = vst.msk [vmem:[%s2839_s1 + $0x144] ss:$8 sm:$0xf0] %vm3_vm0, %v587_v12  }
  0xde   :  { %1310 = vst.msk [vmem:[%s2839_s1 + $0x104] ss:$8 sm:$0xf] %vm3_vm0, %v578_v13   ;;  %1311 = vst.msk [vmem:[%s2839_s1 + $0x104] ss:$8 sm:$0xf0] %vm3_vm0, %v578_v13   ;;  %1105 = vrot.lane.b32.xlu1 %v1597_v14, %s1499_s3  ;;  %1096 = vrot.lane.b32.xlu0 %v1602_v15, %s1499_s3 }
  0xe0   :  { %v605_v14 = vpop.permute.xlu1 %604   ;;  %v596_v15 = vpop.permute.xlu0 %595  }
  0xe1   :  { %1319 = vst.msk [vmem:[%s2839_s1 + $0x1c4] ss:$8 sm:$0xf] %vm3_vm0, %v605_v14   ;;  %1320 = vst.msk [vmem:[%s2839_s1 + $0x1c4] ss:$8 sm:$0xf0] %vm3_vm0, %v605_v14  }
  0xe2   :  { %1316 = vst.msk [vmem:[%s2839_s1 + $0x184] ss:$8 sm:$0xf] %vm3_vm0, %v596_v15   ;;  %1317 = vst.msk [vmem:[%s2839_s1 + $0x184] ss:$8 sm:$0xf0] %vm3_vm0, %v596_v15  }
  0xe4   :  { %v623_v24 = vpop.permute.xlu1 %622   ;;  %v614_v25 = vpop.permute.xlu0 %613  }
  0xe5   :  { %1325 = vst.msk [vmem:[%s2839_s1 + $0x244] ss:$8 sm:$0xf] %vm3_vm0, %v623_v24   ;;  %1326 = vst.msk [vmem:[%s2839_s1 + $0x244] ss:$8 sm:$0xf0] %vm3_vm0, %v623_v24  }
  0xe6   :  { %1322 = vst.msk [vmem:[%s2839_s1 + $0x204] ss:$8 sm:$0xf] %vm3_vm0, %v614_v25   ;;  %1323 = vst.msk [vmem:[%s2839_s1 + $0x204] ss:$8 sm:$0xf0] %vm3_vm0, %v614_v25  }
  0xe8   :  { %v641_v26 = vpop.permute.xlu1 %640   ;;  %v632_v27 = vpop.permute.xlu0 %631  }
  0xe9   :  { %1331 = vst.msk [vmem:[%s2839_s1 + $0x2c4] ss:$8 sm:$0xf] %vm3_vm0, %v641_v26   ;;  %1332 = vst.msk [vmem:[%s2839_s1 + $0x2c4] ss:$8 sm:$0xf0] %vm3_vm0, %v641_v26  }
  0xea   :  { %1328 = vst.msk [vmem:[%s2839_s1 + $0x284] ss:$8 sm:$0xf] %vm3_vm0, %v632_v27   ;;  %1329 = vst.msk [vmem:[%s2839_s1 + $0x284] ss:$8 sm:$0xf0] %vm3_vm0, %v632_v27  }
  0xec   :  { %v659_v28 = vpop.permute.xlu1 %658   ;;  %v650_v29 = vpop.permute.xlu0 %649  }
  0xed   :  { %1337 = vst.msk [vmem:[%s2839_s1 + $0x344] ss:$8 sm:$0xf] %vm3_vm0, %v659_v28   ;;  %1338 = vst.msk [vmem:[%s2839_s1 + $0x344] ss:$8 sm:$0xf0] %vm3_vm0, %v659_v28  }
  0xee   :  { %1334 = vst.msk [vmem:[%s2839_s1 + $0x304] ss:$8 sm:$0xf] %vm3_vm0, %v650_v29   ;;  %1335 = vst.msk [vmem:[%s2839_s1 + $0x304] ss:$8 sm:$0xf0] %vm3_vm0, %v650_v29  }
  0xf0   :  { %v677_v30 = vpop.permute.xlu1 %676   ;;  %v668_v31 = vpop.permute.xlu0 %667  }
  0xf1   :  { %1343 = vst.msk [vmem:[%s2839_s1 + $0x3c4] ss:$8 sm:$0xf] %vm3_vm0, %v677_v30   ;;  %1344 = vst.msk [vmem:[%s2839_s1 + $0x3c4] ss:$8 sm:$0xf0] %vm3_vm0, %v677_v30  }
  0xf2   :  { %1340 = vst.msk [vmem:[%s2839_s1 + $0x384] ss:$8 sm:$0xf] %vm3_vm0, %v668_v31   ;;  %1341 = vst.msk [vmem:[%s2839_s1 + $0x384] ss:$8 sm:$0xf0] %vm3_vm0, %v668_v31  }
  0xf4   :  { %v694_v32 = vpop.permute.xlu1 %693   ;;  %v685_v33 = vpop.permute.xlu0 %684  }
  0xf5   :  { %1348 = vst.msk [vmem:[%s2839_s1 + $0x45] ss:$8 sm:$0xf] %vm3_vm0, %v694_v32   ;;  %1349 = vst.msk [vmem:[%s2839_s1 + $0x45] ss:$8 sm:$0xf0] %vm3_vm0, %v694_v32  }
  0xf6   :  { %1345 = vst.msk [vmem:[%s2839_s1 + $0x5] ss:$8 sm:$0xf] %vm3_vm0, %v685_v33   ;;  %1346 = vst.msk [vmem:[%s2839_s1 + $0x5] ss:$8 sm:$0xf0] %vm3_vm0, %v685_v33  }
  0xf8   :  { %v712_v34 = vpop.permute.xlu1 %711   ;;  %v703_v35 = vpop.permute.xlu0 %702  }
  0xf9   :  { %1354 = vst.msk [vmem:[%s2839_s1 + $0xc5] ss:$8 sm:$0xf] %vm3_vm0, %v712_v34   ;;  %1355 = vst.msk [vmem:[%s2839_s1 + $0xc5] ss:$8 sm:$0xf0] %vm3_vm0, %v712_v34  }
  0xfa   :  { %1351 = vst.msk [vmem:[%s2839_s1 + $0x85] ss:$8 sm:$0xf] %vm3_vm0, %v703_v35   ;;  %1352 = vst.msk [vmem:[%s2839_s1 + $0x85] ss:$8 sm:$0xf0] %vm3_vm0, %v703_v35  }
  0xfc   :  { %v730_v36 = vpop.permute.xlu1 %729   ;;  %v721_v37 = vpop.permute.xlu0 %720  }
  0xfd   :  { %1360 = vst.msk [vmem:[%s2839_s1 + $0x145] ss:$8 sm:$0xf] %vm3_vm0, %v730_v36   ;;  %1361 = vst.msk [vmem:[%s2839_s1 + $0x145] ss:$8 sm:$0xf0] %vm3_vm0, %v730_v36  }
  0xfe   :  { %1357 = vst.msk [vmem:[%s2839_s1 + $0x105] ss:$8 sm:$0xf] %vm3_vm0, %v721_v37   ;;  %1358 = vst.msk [vmem:[%s2839_s1 + $0x105] ss:$8 sm:$0xf0] %vm3_vm0, %v721_v37  }
 0x100   :  { %v748_v38 = vpop.permute.xlu1 %747   ;;  %v739_v39 = vpop.permute.xlu0 %738  }
 0x101   :  { %1366 = vst.msk [vmem:[%s2839_s1 + $0x1c5] ss:$8 sm:$0xf] %vm3_vm0, %v748_v38   ;;  %1367 = vst.msk [vmem:[%s2839_s1 + $0x1c5] ss:$8 sm:$0xf0] %vm3_vm0, %v748_v38  }
 0x102   :  { %1363 = vst.msk [vmem:[%s2839_s1 + $0x185] ss:$8 sm:$0xf] %vm3_vm0, %v739_v39   ;;  %1364 = vst.msk [vmem:[%s2839_s1 + $0x185] ss:$8 sm:$0xf0] %vm3_vm0, %v739_v39  }
 0x104   :  { %v766_v40 = vpop.permute.xlu1 %765   ;;  %v757_v41 = vpop.permute.xlu0 %756  }
 0x105   :  { %1372 = vst.msk [vmem:[%s2839_s1 + $0x245] ss:$8 sm:$0xf] %vm3_vm0, %v766_v40   ;;  %1373 = vst.msk [vmem:[%s2839_s1 + $0x245] ss:$8 sm:$0xf0] %vm3_vm0, %v766_v40  }
 0x106   :  { %1369 = vst.msk [vmem:[%s2839_s1 + $0x205] ss:$8 sm:$0xf] %vm3_vm0, %v757_v41   ;;  %1370 = vst.msk [vmem:[%s2839_s1 + $0x205] ss:$8 sm:$0xf0] %vm3_vm0, %v757_v41  }
 0x108   :  { %v784_v42 = vpop.permute.xlu1 %783   ;;  %v775_v43 = vpop.permute.xlu0 %774  }
 0x109   :  { %1378 = vst.msk [vmem:[%s2839_s1 + $0x2c5] ss:$8 sm:$0xf] %vm3_vm0, %v784_v42   ;;  %1379 = vst.msk [vmem:[%s2839_s1 + $0x2c5] ss:$8 sm:$0xf0] %vm3_vm0, %v784_v42  }
 0x10a   :  { %1375 = vst.msk [vmem:[%s2839_s1 + $0x285] ss:$8 sm:$0xf] %vm3_vm0, %v775_v43   ;;  %1376 = vst.msk [vmem:[%s2839_s1 + $0x285] ss:$8 sm:$0xf0] %vm3_vm0, %v775_v43  }
 0x10c   :  { %v802_v44 = vpop.permute.xlu1 %801   ;;  %v793_v45 = vpop.permute.xlu0 %792  }
 0x10d   :  { %1384 = vst.msk [vmem:[%s2839_s1 + $0x345] ss:$8 sm:$0xf] %vm3_vm0, %v802_v44   ;;  %1385 = vst.msk [vmem:[%s2839_s1 + $0x345] ss:$8 sm:$0xf0] %vm3_vm0, %v802_v44  }
 0x10e   :  { %1381 = vst.msk [vmem:[%s2839_s1 + $0x305] ss:$8 sm:$0xf] %vm3_vm0, %v793_v45   ;;  %1382 = vst.msk [vmem:[%s2839_s1 + $0x305] ss:$8 sm:$0xf0] %vm3_vm0, %v793_v45  }
 0x110   :  { %v820_v46 = vpop.permute.xlu1 %819   ;;  %v811_v47 = vpop.permute.xlu0 %810  }
 0x111   :  { %1390 = vst.msk [vmem:[%s2839_s1 + $0x3c5] ss:$8 sm:$0xf] %vm3_vm0, %v820_v46   ;;  %1391 = vst.msk [vmem:[%s2839_s1 + $0x3c5] ss:$8 sm:$0xf0] %vm3_vm0, %v820_v46  }
 0x112   :  { %1387 = vst.msk [vmem:[%s2839_s1 + $0x385] ss:$8 sm:$0xf] %vm3_vm0, %v811_v47   ;;  %1388 = vst.msk [vmem:[%s2839_s1 + $0x385] ss:$8 sm:$0xf0] %vm3_vm0, %v811_v47  }
 0x114   :  { %v837_v48 = vpop.permute.xlu1 %836   ;;  %v828_v49 = vpop.permute.xlu0 %827  }
 0x115   :  { %1395 = vst.msk [vmem:[%s2839_s1 + $0x46] ss:$8 sm:$0xf] %vm3_vm0, %v837_v48   ;;  %1396 = vst.msk [vmem:[%s2839_s1 + $0x46] ss:$8 sm:$0xf0] %vm3_vm0, %v837_v48  }
 0x116   :  { %1392 = vst.msk [vmem:[%s2839_s1 + $0x6] ss:$8 sm:$0xf] %vm3_vm0, %v828_v49   ;;  %1393 = vst.msk [vmem:[%s2839_s1 + $0x6] ss:$8 sm:$0xf0] %vm3_vm0, %v828_v49  }
 0x118   :  { %v855_v50 = vpop.permute.xlu1 %854   ;;  %v846_v51 = vpop.permute.xlu0 %845  }
 0x119   :  { %1401 = vst.msk [vmem:[%s2839_s1 + $0xc6] ss:$8 sm:$0xf] %vm3_vm0, %v855_v50   ;;  %1402 = vst.msk [vmem:[%s2839_s1 + $0xc6] ss:$8 sm:$0xf0] %vm3_vm0, %v855_v50  }
 0x11a   :  { %1398 = vst.msk [vmem:[%s2839_s1 + $0x86] ss:$8 sm:$0xf] %vm3_vm0, %v846_v51   ;;  %1399 = vst.msk [vmem:[%s2839_s1 + $0x86] ss:$8 sm:$0xf0] %vm3_vm0, %v846_v51  }
 0x11c   :  { %v873_v52 = vpop.permute.xlu1 %872   ;;  %v864_v53 = vpop.permute.xlu0 %863  }
 0x11d   :  { %1407 = vst.msk [vmem:[%s2839_s1 + $0x146] ss:$8 sm:$0xf] %vm3_vm0, %v873_v52   ;;  %1408 = vst.msk [vmem:[%s2839_s1 + $0x146] ss:$8 sm:$0xf0] %vm3_vm0, %v873_v52  }
 0x11e   :  { %1404 = vst.msk [vmem:[%s2839_s1 + $0x106] ss:$8 sm:$0xf] %vm3_vm0, %v864_v53   ;;  %1405 = vst.msk [vmem:[%s2839_s1 + $0x106] ss:$8 sm:$0xf0] %vm3_vm0, %v864_v53  }
 0x120   :  { %v891_v54 = vpop.permute.xlu1 %890   ;;  %v882_v55 = vpop.permute.xlu0 %881  }
 0x121   :  { %1413 = vst.msk [vmem:[%s2839_s1 + $0x1c6] ss:$8 sm:$0xf] %vm3_vm0, %v891_v54   ;;  %1414 = vst.msk [vmem:[%s2839_s1 + $0x1c6] ss:$8 sm:$0xf0] %vm3_vm0, %v891_v54  }
 0x122   :  { %1410 = vst.msk [vmem:[%s2839_s1 + $0x186] ss:$8 sm:$0xf] %vm3_vm0, %v882_v55   ;;  %1411 = vst.msk [vmem:[%s2839_s1 + $0x186] ss:$8 sm:$0xf0] %vm3_vm0, %v882_v55  }
 0x124   :  { %v909_v56 = vpop.permute.xlu1 %908   ;;  %v900_v57 = vpop.permute.xlu0 %899  }
 0x125   :  { %1419 = vst.msk [vmem:[%s2839_s1 + $0x246] ss:$8 sm:$0xf] %vm3_vm0, %v909_v56   ;;  %1420 = vst.msk [vmem:[%s2839_s1 + $0x246] ss:$8 sm:$0xf0] %vm3_vm0, %v909_v56  }
 0x126   :  { %1416 = vst.msk [vmem:[%s2839_s1 + $0x206] ss:$8 sm:$0xf] %vm3_vm0, %v900_v57   ;;  %1417 = vst.msk [vmem:[%s2839_s1 + $0x206] ss:$8 sm:$0xf0] %vm3_vm0, %v900_v57  }
 0x128   :  { %v927_v58 = vpop.permute.xlu1 %926   ;;  %v918_v59 = vpop.permute.xlu0 %917  }
 0x129   :  { %1425 = vst.msk [vmem:[%s2839_s1 + $0x2c6] ss:$8 sm:$0xf] %vm3_vm0, %v927_v58   ;;  %1426 = vst.msk [vmem:[%s2839_s1 + $0x2c6] ss:$8 sm:$0xf0] %vm3_vm0, %v927_v58  }
 0x12a   :  { %1422 = vst.msk [vmem:[%s2839_s1 + $0x286] ss:$8 sm:$0xf] %vm3_vm0, %v918_v59   ;;  %1423 = vst.msk [vmem:[%s2839_s1 + $0x286] ss:$8 sm:$0xf0] %vm3_vm0, %v918_v59  }
 0x12c   :  { %v945_v60 = vpop.permute.xlu1 %944   ;;  %v936_v61 = vpop.permute.xlu0 %935  }
 0x12d   :  { %1431 = vst.msk [vmem:[%s2839_s1 + $0x346] ss:$8 sm:$0xf] %vm3_vm0, %v945_v60   ;;  %1432 = vst.msk [vmem:[%s2839_s1 + $0x346] ss:$8 sm:$0xf0] %vm3_vm0, %v945_v60  }
 0x12e   :  { %1428 = vst.msk [vmem:[%s2839_s1 + $0x306] ss:$8 sm:$0xf] %vm3_vm0, %v936_v61   ;;  %1429 = vst.msk [vmem:[%s2839_s1 + $0x306] ss:$8 sm:$0xf0] %vm3_vm0, %v936_v61  }
 0x130   :  { %v963_v62 = vpop.permute.xlu1 %962   ;;  %v954_v63 = vpop.permute.xlu0 %953  }
 0x131   :  { %1437 = vst.msk [vmem:[%s2839_s1 + $0x3c6] ss:$8 sm:$0xf] %vm3_vm0, %v963_v62   ;;  %1438 = vst.msk [vmem:[%s2839_s1 + $0x3c6] ss:$8 sm:$0xf0] %vm3_vm0, %v963_v62  }
 0x132   :  { %1434 = vst.msk [vmem:[%s2839_s1 + $0x386] ss:$8 sm:$0xf] %vm3_vm0, %v954_v63   ;;  %1435 = vst.msk [vmem:[%s2839_s1 + $0x386] ss:$8 sm:$0xf0] %vm3_vm0, %v954_v63  }
 0x134   :  { %v980_v0 = vpop.permute.xlu1 %979   ;;  %v971_v1 = vpop.permute.xlu0 %970  }
 0x135   :  { %1442 = vst.msk [vmem:[%s2839_s1 + $0x47] ss:$8 sm:$0xf] %vm3_vm0, %v980_v0   ;;  %1443 = vst.msk [vmem:[%s2839_s1 + $0x47] ss:$8 sm:$0xf0] %vm3_vm0, %v980_v0  }
 0x136   :  { %1439 = vst.msk [vmem:[%s2839_s1 + $0x7] ss:$8 sm:$0xf] %vm3_vm0, %v971_v1   ;;  %1440 = vst.msk [vmem:[%s2839_s1 + $0x7] ss:$8 sm:$0xf0] %vm3_vm0, %v971_v1  }
 0x138   :  { %v998_v2 = vpop.permute.xlu1 %997   ;;  %v989_v3 = vpop.permute.xlu0 %988  }
 0x139   :  { %1448 = vst.msk [vmem:[%s2839_s1 + $0xc7] ss:$8 sm:$0xf] %vm3_vm0, %v998_v2   ;;  %1449 = vst.msk [vmem:[%s2839_s1 + $0xc7] ss:$8 sm:$0xf0] %vm3_vm0, %v998_v2  }
 0x13a   :  { %1445 = vst.msk [vmem:[%s2839_s1 + $0x87] ss:$8 sm:$0xf] %vm3_vm0, %v989_v3   ;;  %1446 = vst.msk [vmem:[%s2839_s1 + $0x87] ss:$8 sm:$0xf0] %vm3_vm0, %v989_v3  }
 0x13c   :  { %v1016_v4 = vpop.permute.xlu1 %1015   ;;  %v1007_v5 = vpop.permute.xlu0 %1006  }
 0x13d   :  { %1454 = vst.msk [vmem:[%s2839_s1 + $0x147] ss:$8 sm:$0xf] %vm3_vm0, %v1016_v4   ;;  %1455 = vst.msk [vmem:[%s2839_s1 + $0x147] ss:$8 sm:$0xf0] %vm3_vm0, %v1016_v4  }
 0x13e   :  { %1451 = vst.msk [vmem:[%s2839_s1 + $0x107] ss:$8 sm:$0xf] %vm3_vm0, %v1007_v5   ;;  %1452 = vst.msk [vmem:[%s2839_s1 + $0x107] ss:$8 sm:$0xf0] %vm3_vm0, %v1007_v5  }
 0x140   :  { %v1034_v6 = vpop.permute.xlu1 %1033   ;;  %v1025_v7 = vpop.permute.xlu0 %1024  }
 0x141   :  { %1460 = vst.msk [vmem:[%s2839_s1 + $0x1c7] ss:$8 sm:$0xf] %vm3_vm0, %v1034_v6   ;;  %1461 = vst.msk [vmem:[%s2839_s1 + $0x1c7] ss:$8 sm:$0xf0] %vm3_vm0, %v1034_v6  }
 0x142   :  { %1457 = vst.msk [vmem:[%s2839_s1 + $0x187] ss:$8 sm:$0xf] %vm3_vm0, %v1025_v7   ;;  %1458 = vst.msk [vmem:[%s2839_s1 + $0x187] ss:$8 sm:$0xf0] %vm3_vm0, %v1025_v7  }
 0x144   :  { %v1052_v8 = vpop.permute.xlu1 %1051   ;;  %v1043_v9 = vpop.permute.xlu0 %1042  }
 0x145   :  { %1466 = vst.msk [vmem:[%s2839_s1 + $0x247] ss:$8 sm:$0xf] %vm3_vm0, %v1052_v8   ;;  %1467 = vst.msk [vmem:[%s2839_s1 + $0x247] ss:$8 sm:$0xf0] %vm3_vm0, %v1052_v8  }
 0x146   :  { %1463 = vst.msk [vmem:[%s2839_s1 + $0x207] ss:$8 sm:$0xf] %vm3_vm0, %v1043_v9   ;;  %1464 = vst.msk [vmem:[%s2839_s1 + $0x207] ss:$8 sm:$0xf0] %vm3_vm0, %v1043_v9  }
 0x148   :  { %v1070_v16 = vpop.permute.xlu1 %1069   ;;  %v1061_v17 = vpop.permute.xlu0 %1060  }
 0x149   :  { %1472 = vst.msk [vmem:[%s2839_s1 + $0x2c7] ss:$8 sm:$0xf] %vm3_vm0, %v1070_v16   ;;  %1473 = vst.msk [vmem:[%s2839_s1 + $0x2c7] ss:$8 sm:$0xf0] %vm3_vm0, %v1070_v16  }
 0x14a   :  { %1469 = vst.msk [vmem:[%s2839_s1 + $0x287] ss:$8 sm:$0xf] %vm3_vm0, %v1061_v17   ;;  %1470 = vst.msk [vmem:[%s2839_s1 + $0x287] ss:$8 sm:$0xf0] %vm3_vm0, %v1061_v17  }
 0x14c   :  { %v1088_v18 = vpop.permute.xlu1 %1087   ;;  %v1079_v19 = vpop.permute.xlu0 %1078  }
 0x14d   :  { %1478 = vst.msk [vmem:[%s2839_s1 + $0x347] ss:$8 sm:$0xf] %vm3_vm0, %v1088_v18   ;;  %1479 = vst.msk [vmem:[%s2839_s1 + $0x347] ss:$8 sm:$0xf0] %vm3_vm0, %v1088_v18  }
 0x14e   :  { %1475 = vst.msk [vmem:[%s2839_s1 + $0x307] ss:$8 sm:$0xf] %vm3_vm0, %v1079_v19   ;;  %1476 = vst.msk [vmem:[%s2839_s1 + $0x307] ss:$8 sm:$0xf0] %vm3_vm0, %v1079_v19  }
 0x150   :  { %v1106_v20 = vpop.permute.xlu1 %1105   ;;  %v1097_v21 = vpop.permute.xlu0 %1096  }
 0x151   :  { %1484 = vst.msk [vmem:[%s2839_s1 + $0x3c7] ss:$8 sm:$0xf] %vm3_vm0, %v1106_v20   ;;  %1485 = vst.msk [vmem:[%s2839_s1 + $0x3c7] ss:$8 sm:$0xf0] %vm3_vm0, %v1106_v20  }
 0x152   :  { %1481 = vst.msk [vmem:[%s2839_s1 + $0x387] ss:$8 sm:$0xf] %vm3_vm0, %v1097_v21   ;;  %1482 = vst.msk [vmem:[%s2839_s1 + $0x387] ss:$8 sm:$0xf0] %vm3_vm0, %v1097_v21  }

// kernel: _psg_compute.1
= control target key start
LH: loop header
LB: loop body
LE: loop exit
PB: predicated region body
PF: predicated region fallthrough
CT: control target
= control target key end

     0   :  { %s1173_s0 = inlined_call_operand.vmem [shape: s32[4], index: 0, kind: input, shape index: {}, may-alias: {0,1}]   ;;  %s1174_s4 = inlined_call_operand.vmem [shape: f32[128,512], index: 4, kind: input, shape index: {}]   ;;  %s1175_s5 = inlined_call_operand.vmem [shape: f32[2,4,128,128], index: 5, kind: output, shape index: {}]   ;;  %s1176_s1 = inlined_call_operand.vmem [shape: s32[4], index: 1, kind: input, shape index: {}, may-alias: {0,1}]   ;;  %s1177_s2 = inlined_call_operand.vmem [shape: s32[4], index: 2, kind: input, shape index: {}, may-alias: {2,3}]   ;;  %s1178_s3 = inlined_call_operand.vmem [shape: s32[4], index: 3, kind: input, shape index: {}, may-alias: {2,3}]  }
   0x1   :  { %s10_s20 = sshll.u32 %s1173_s0, 4  ;;  %s14_s23 = sshll.u32 %s1176_s1, 4  ;;  %s11_s20 = int_to_ptr.vmem [resolvable:$true] %s10_s20  ;;  %s15_s23 = int_to_ptr.vmem [resolvable:$true] %s14_s23 }
   0x2   :  { %s840_s24 = scalar_lea.vmem %s11_s20, 16  ;;  %p845_p1 = scmp.lt.s32.totalorder %s11_s20, %s11_s20 }
   0x3   :  { %p841_p0 = scmp.ne.s32.totalorder %s11_s20, %s840_s24  ;;  %p846_p2 = scmp.lt.s32.totalorder %s840_s24, %s840_s24 }
   0x5   :  { %p847_p3 = por %p846_p2, %p845_p1 }
   0x7   :  { %p848_p4 = pnand %p847_p3, %p841_p0 }
   0x9   :  { %851 = shalt.err (!%p848_p4)  }
   0xa   :  { %s946_s25 = smov [#allocation3]   ;;  %s852_s26 = scalar_lea.vmem %s15_s23, 16 }
   0xb   :  { %13 = dma.vmem_to_smem %s11_s20, 16, %s946_s25, [#allocation2] }
   0xc   :  { %p853_p5 = scmp.ne.s32.totalorder %s15_s23, %s852_s26  ;;  %p857_p6 = scmp.lt.s32.totalorder %s15_s23, %s15_s23 }
   0xd   :  { %p858_p7 = scmp.lt.s32.totalorder %s852_s26, %s852_s26 }
   0xf   :  { %p859_p8 = por %p858_p7, %p857_p6 }
  0x11   :  { %p860_p9 = pnand %p859_p8, %p853_p5 }
  0x13   :  { %863 = shalt.err (!%p860_p9)  }
  0x14   :  { %s947_s0 = smov [#allocation4]   ;;  %s18_s28 = sshll.u32 %s1177_s2, 4  ;;  %s19_s28 = int_to_ptr.vmem [resolvable:$true] %s18_s28 }
  0x15   :  { %17 = dma.vmem_to_smem %s15_s23, 16, %s947_s0, [#allocation2] }
  0x16   :  { %s22_s6 = sshll.u32 %s1178_s3, 4  ;;  %s864_s7 = scalar_lea.vmem %s19_s28, 16  ;;  %s23_s6 = int_to_ptr.vmem [resolvable:$true] %s22_s6 }
  0x17   :  { %p865_p10 = scmp.ne.s32.totalorder %s19_s28, %s864_s7  ;;  %p869_p11 = scmp.lt.s32.totalorder %s19_s28, %s19_s28 }
  0x18   :  { %p870_p12 = scmp.lt.s32.totalorder %s864_s7, %s864_s7 }
  0x1a   :  { %p871_p13 = por %p870_p12, %p869_p11 }
  0x1c   :  { %p872_p0 = pnand %p871_p13, %p865_p10 }
  0x1e   :  { %875 = shalt.err (!%p872_p0)  }
  0x1f   :  { %s948_s8 = smov [#allocation5]   ;;  %s876_s9 = scalar_lea.vmem %s23_s6, 16 }
  0x20   :  { %21 = dma.vmem_to_smem %s19_s28, 16, %s948_s8, [#allocation2] }
  0x21   :  { %p877_p1 = scmp.ne.s32.totalorder %s23_s6, %s876_s9  ;;  %p881_p2 = scmp.lt.s32.totalorder %s23_s6, %s23_s6 }
  0x22   :  { %p882_p3 = scmp.lt.s32.totalorder %s876_s9, %s876_s9 }
  0x24   :  { %p883_p4 = por %p882_p3, %p881_p2 }
  0x26   :  { %p884_p5 = pnand %p883_p4, %p877_p1 }
  0x28   :  { %887 = shalt.err (!%p884_p5)  }
  0x29   :  { %s949_s2 = smov [#allocation6]  }
  0x2a   :  { %25 = dma.vmem_to_smem %s23_s6, 16, %s949_s2, [#allocation2] }
  0x2b   :  { %916 = dma.done.wait [#allocation2], 64 }
  0x2c   :  { %917 = vsyncadd [#allocation2], 4294967232 }
  0x2d   :  { %27 = sfence }
  0x2e   :  { %s993_s3 = smov 0   ;;  %s995_s10 = smov 0  }
  0x2f   :  { %s997_s11 = smov 0   ;;  %s999_s12 = smov 0  }
  0x30   :  { %s1001_s13 = smov 0   ;;  %s1003_s14 = smov 0  }
  0x31   :  { %s1005_s15 = smov 0  }
  0x32 LB: > { %s42_s16 = sadd.s32 1, %s936_s13  ;;  %s45_s17 = sadd.s32 1, %s940_s14  ;;  %s944_s15 = sphi %s1005_s15, %s33_s15   ;;  %s940_s14 = sphi %s1003_s14, %s1184_s14   ;;  %s936_s13 = sphi %s1001_s13, %s1183_s13   ;;  %s932_s12 = sphi %s999_s12, %s1182_s12   ;;  %s928_s11 = sphi %s997_s11, %s1181_s11   ;;  %s924_s10 = sphi %s995_s10, %s1180_s10   ;;  %s920_s3 = sphi %s993_s3, %s1179_s3  }
  0x33   : > { %p43_p6 = scmp.ge.s32.totalorder %s42_s16, 2  ;;  %s623_s18 = sshll.u32 %s940_s14, 1 }
  0x34   : > { %s50_s19 = sadd.s32 %s936_s13, %s623_s18  ;;  %p65_p7 = scmp.ne.s32.totalorder %s924_s10, %s920_s3 }
  0x35   : > { %s1186_s17 = smov (!%p43_p6, %s45_s17), %s940_s14  ;;  %p66_p9 = scmp.eq.s32.totalorder %s944_s15, 0 }
  0x36   : > { %p47_p8 = scmp.ge.s32.totalorder %s1186_s17, 2  ;;  %s1188_s16 = smov (%p43_p6, %s42_s16), 0 }
  0x37   : > { %p67_p10 = por %p66_p9, %p65_p7  ;;  %s51_s20 = sld [smem:[#allocation4 + %s50_s19]] }
  0x38   : > { %s1190_s17 = smov (%p47_p8, %s1186_s17), 0  ;;  %s58_s25 = sadd.s32 1, %s924_s10 }
  0x39   : > { %s624_s21 = sshll.u32 %s1190_s17, 1  ;;  %p628_p12 = scmp.ge.s32.totalorder %s944_s15, 4 }
  0x3a   : > { %s53_s22 = sadd.s32 %s624_s21, %s1188_s16 }
  0x3b   : > { %s54_s23 = sld [smem:[#allocation4 + %s53_s22]] }
  0x3e   : > { %125 = sbr.rel (%p628_p12) target bundleno = 95 (0x5f), region = 16 }
  0x41   : > { %s55_s24 = ssub.s32 %s51_s20, %s54_s23 }
  0x42   : > { %p56_p11 = scmp.eq.s32.totalorder %s55_s24, 0 }
  0x44   : > { %s1044_s26 = scalar_select %p56_p11, %s924_s10, %s58_s25  }
  0x45   : > { %128 = sbr.rel (!%p67_p10) target bundleno = 95 (0x5f), region = 20  ;;  %s130_s0 = sand.u32 (%p67_p10), 1, %s924_s10  }
  0x46   : > { %s135_s1 = sld [smem:[#allocation4 + %s50_s19]] (%p67_p10)  ;;  %s629_s27 = sshll.u32 (%p67_p10), %s130_s0, 7 }
  0x47   : > { %s132_s7 = scalar_lea.vmem (%p67_p10), [#allocation7], %s629_s27 }
  0x4c   : > { %s631_s28 = sshll.u32 %s135_s1, 3 }
  0x4d   : > { %s1051_s6 = scalar_lea.vmem %s1174_s4, %s631_s28 }
  0x4e   : > { %v195_v0 = vld [vmem:[%s1051_s6] sm:$0xff] }
  0x4f   : > { %v197_v1 = vld [vmem:[%s1051_s6 + $0x20] sm:$0xff]  ;;  %196 = vst [vmem:[%s132_s7] sm:$0xff] %v195_v0 }
  0x50   : > { %v199_v2 = vld [vmem:[%s1051_s6 + $0x40] sm:$0xff]  ;;  %198 = vst [vmem:[%s132_s7 + $0x8] sm:$0xff] %v197_v1 }
  0x51   : > { %200 = vst [vmem:[%s132_s7 + $0x10] sm:$0xff] %v199_v2  ;;  %v201_v3 = vld [vmem:[%s1051_s6 + $0x60] sm:$0xff] }
  0x52   : > { %v203_v4 = vld [vmem:[%s1051_s6 + $0x80] sm:$0xff]  ;;  %202 = vst [vmem:[%s132_s7 + $0x18] sm:$0xff] %v201_v3 }
  0x53   : > { %v205_v5 = vld [vmem:[%s1051_s6 + $0xa0] sm:$0xff]  ;;  %204 = vst [vmem:[%s132_s7 + $0x20] sm:$0xff] %v203_v4 }
  0x54   : > { %206 = vst [vmem:[%s132_s7 + $0x28] sm:$0xff] %v205_v5  ;;  %v207_v6 = vld [vmem:[%s1051_s6 + $0xc0] sm:$0xff] }
  0x55   : > { %v209_v7 = vld [vmem:[%s1051_s6 + $0xe0] sm:$0xff]  ;;  %208 = vst [vmem:[%s132_s7 + $0x30] sm:$0xff] %v207_v6 }
  0x56   : > { %v211_v8 = vld [vmem:[%s1051_s6 + $0x100] sm:$0xff]  ;;  %210 = vst [vmem:[%s132_s7 + $0x38] sm:$0xff] %v209_v7 }
  0x57   : > { %212 = vst [vmem:[%s132_s7 + $0x40] sm:$0xff] %v211_v8  ;;  %v213_v9 = vld [vmem:[%s1051_s6 + $0x120] sm:$0xff] }
  0x58   : > { %v215_v10 = vld [vmem:[%s1051_s6 + $0x140] sm:$0xff]  ;;  %214 = vst [vmem:[%s132_s7 + $0x48] sm:$0xff] %v213_v9 }
  0x59   : > { %v217_v11 = vld [vmem:[%s1051_s6 + $0x160] sm:$0xff]  ;;  %216 = vst [vmem:[%s132_s7 + $0x50] sm:$0xff] %v215_v10 }
  0x5a   : > { %218 = vst [vmem:[%s132_s7 + $0x58] sm:$0xff] %v217_v11  ;;  %v219_v12 = vld [vmem:[%s1051_s6 + $0x180] sm:$0xff] }
  0x5b   : > { %v221_v13 = vld [vmem:[%s1051_s6 + $0x1a0] sm:$0xff]  ;;  %220 = vst [vmem:[%s132_s7 + $0x60] sm:$0xff] %v219_v12 }
  0x5c   : > { %v223_v14 = vld [vmem:[%s1051_s6 + $0x1c0] sm:$0xff]  ;;  %222 = vst [vmem:[%s132_s7 + $0x68] sm:$0xff] %v221_v13 }
  0x5d   : > { %224 = vst [vmem:[%s132_s7 + $0x70] sm:$0xff] %v223_v14  ;;  %v225_v15 = vld [vmem:[%s1051_s6 + $0x1e0] sm:$0xff] }
  0x5e   : > { %226 = vst [vmem:[%s132_s7 + $0x78] sm:$0xff] %v225_v15 }
  0x5f PF: > { %p632_p13 = scmp.ge.s32.totalorder %s944_s15, 1  ;;  %p231_p0 = scmp.lt.s32.totalorder %s944_s15, 5 }
  0x61   : > { %p232_p1 = pnand %p632_p13, %p231_p0 }
  0x62   : > { %s238_s8 = sand.u32 (!%p232_p1), 1, %s920_s3   ;;  %s634_s9 = sshll.u32 (!%p232_p1), %s932_s12, 1 }
  0x63   : > { %235 = sbr.rel (%p232_p1) target bundleno = 424 (0x1a8), region = 58  ;;  %s633_s2 = sshll.u32 (!%p232_p1), %s238_s8, 7 }
  0x64   : > { %s1074_s18 = sadd.s32 (!%p232_p1), %s928_s11, %s634_s9  ;;  %p270_p2 = scmp.lt.s32.totalorder (!%p232_p1), %s932_s12, 1 }
  0x65   : > { %s269_s19 = sld [smem:[#allocation3 + %s1074_s18]] (!%p232_p1)  ;;  %s1085_s1 = scalar_lea.vmem (!%p232_p1), [#allocation7], %s633_s2 }
  0x66   : > { %s284_s20 = sld [smem:[#allocation5 + %s1074_s18]] (!%p232_p1) }
  0x6a   : > { %s1192_s12 = smov (!%p270_p2, %s932_s12), 1 }
  0x6b   : > { %p272_p3 = scmp.lt.s32.totalorder %s269_s19, 3  ;;  %s636_s21 = sshll.u32 %s1192_s12, 6 }
  0x6c   : > { %p639_p4 = scmp.ne.s32.totalorder %s284_s20, 1 }
  0x6d   : > { %s1194_s19 = smov (!%p272_p3, %s269_s19), 3  ;;  %v950_v16 = vmov (!%p639_p4), 0.0  }
  0x6e   : > { %s635_s22 = sshll.u32 %s1194_s19, 4  ;;  %288 = sbr.rel (%p639_p4) target bundleno = 122 (0x7a), region = 66 }
  0x6f   : > { %s276_s23 = sadd.s32 %s636_s21, %s635_s22 }
  0x70   : > { %s637_s24 = sshll.u32 %s276_s23, 3 }
  0x71   : > { %s1083_s3 = scalar_lea.vmem %s1175_s5, %s637_s24 }
  0x72   : > { %289 = vst [vmem:[%s1083_s3] sm:$0xff] (!%p639_p4), %v950_v16  ;;  %290 = vst [vmem:[%s1083_s3 + $0x8] sm:$0xff] (!%p639_p4), %v950_v16 }
  0x73   : > { %291 = vst [vmem:[%s1083_s3 + $0x10] sm:$0xff] (!%p639_p4), %v950_v16  ;;  %292 = vst [vmem:[%s1083_s3 + $0x18] sm:$0xff] (!%p639_p4), %v950_v16 }
  0x74   : > { %293 = vst [vmem:[%s1083_s3 + $0x20] sm:$0xff] (!%p639_p4), %v950_v16  ;;  %294 = vst [vmem:[%s1083_s3 + $0x28] sm:$0xff] (!%p639_p4), %v950_v16 }
  0x75   : > { %295 = vst [vmem:[%s1083_s3 + $0x30] sm:$0xff] %v950_v16  ;;  %296 = vst [vmem:[%s1083_s3 + $0x38] sm:$0xff] %v950_v16 }
  0x76   : > { %297 = vst [vmem:[%s1083_s3 + $0x40] sm:$0xff] %v950_v16  ;;  %298 = vst [vmem:[%s1083_s3 + $0x48] sm:$0xff] %v950_v16 }
  0x77   : > { %299 = vst [vmem:[%s1083_s3 + $0x50] sm:$0xff] %v950_v16  ;;  %300 = vst [vmem:[%s1083_s3 + $0x58] sm:$0xff] %v950_v16 }
  0x78   : > { %301 = vst [vmem:[%s1083_s3 + $0x60] sm:$0xff] %v950_v16  ;;  %302 = vst [vmem:[%s1083_s3 + $0x68] sm:$0xff] %v950_v16 }
  0x79   : > { %303 = vst [vmem:[%s1083_s3 + $0x70] sm:$0xff] %v950_v16  ;;  %304 = vst [vmem:[%s1083_s3 + $0x78] sm:$0xff] %v950_v16 }
  0x7a PF: > { %s305_s11 = sld [smem:[#allocation6 + %s1074_s18]] }
  0x80   : > { %p640_p5 = scmp.ne.s32.totalorder %s305_s11, 1 }
  0x81   : > { %v310_v17 = vld [vmem:[%s1085_s1] sm:$0xff] (!%p640_p5)  ;;  %v311_v18 = vld [vmem:[%s1085_s1 + $0x8] sm:$0xff] (!%p640_p5)  ;;  %v312_v19 = vld [vmem:[%s1085_s1 + $0x10] sm:$0xff] (!%p640_p5) }
  0x82   : > { %309 = sbr.rel (%p640_p5) target bundleno = 424 (0x1a8), region = 70  ;;  %v731_v20 = vpack.c.bf16 (!%p640_p5), %v311_v18, %v310_v17  ;;  %v313_v21 = vld [vmem:[%s1085_s1 + $0x18] sm:$0xff] (!%p640_p5)  ;;  %707 = vmatprep.mubr.f32.mxu0 (!%p640_p5), %v310_v17  ;;  %v318_v23 = vld [vmem:[%s1085_s1 + $0x40] sm:$0xff] (!%p640_p5)  ;;  %v315_v25 = vld [vmem:[%s1085_s1 + $0x28] sm:$0xff] (!%p640_p5) }
  0x83   : > { %v735_v22 = vpack.c.bf16 (!%p640_p5), %v313_v21, %v312_v19  ;;  %v314_v24 = vld [vmem:[%s1085_s1 + $0x20] sm:$0xff] (!%p640_p5)  ;;  %719 = vmatprep.mubr.f32.mxu1 (!%p640_p5), %v318_v23  ;;  %v316_v27 = vld [vmem:[%s1085_s1 + $0x30] sm:$0xff] (!%p640_p5)  ;;  %v317_v28 = vld [vmem:[%s1085_s1 + $0x38] sm:$0xff] (!%p640_p5) }
  0x84   : > { %732 = vmatprep.subr.bf16.mxu0 (!%p640_p5), %v731_v20  ;;  %763 = vmatprep.subr.bf16.mxu1 (!%p640_p5), %v731_v20  ;;  %v739_v26 = vpack.c.bf16 (!%p640_p5), %v315_v25, %v314_v24  ;;  %v743_v29 = vpack.c.bf16 (!%p640_p5), %v317_v28, %v316_v27  ;;  %v319_v30 = vld [vmem:[%s1085_s1 + $0x48] sm:$0xff] (!%p640_p5)  ;;  %v320_v32 = vld [vmem:[%s1085_s1 + $0x50] sm:$0xff] (!%p640_p5)  ;;  %v321_v33 = vld [vmem:[%s1085_s1 + $0x58] sm:$0xff] (!%p640_p5) }
  0x85   : > { %734 = vmatpush3.bf16.xpose.msra.mxu0 (!%p640_p5), %v731_v20  ;;  %771 = vmatpush3.bf16.xpose.msra.mxu1 (!%p640_p5), %v731_v20  ;;  %v747_v31 = vpack.c.bf16 (!%p640_p5), %v319_v30, %v318_v23  ;;  %v751_v34 = vpack.c.bf16 (!%p640_p5), %v321_v33, %v320_v32  ;;  %v322_v35 = vld [vmem:[%s1085_s1 + $0x60] sm:$0xff] (!%p640_p5)  ;;  %v323_v36 = vld [vmem:[%s1085_s1 + $0x68] sm:$0xff] (!%p640_p5)  ;;  %v324_v38 = vld [vmem:[%s1085_s1 + $0x70] sm:$0xff] (!%p640_p5) }
  0x86   : > { %736 = vmatprep.subr.bf16.mxu0 (!%p640_p5), %v735_v22  ;;  %764 = vmatprep.subr.bf16.mxu1 (!%p640_p5), %v735_v22  ;;  %v755_v37 = vpack.c.bf16 (!%p640_p5), %v323_v36, %v322_v35  ;;  %v325_v39 = vld [vmem:[%s1085_s1 + $0x78] sm:$0xff] (!%p640_p5)  ;;  %v472_v41 = vld [vmem:[%s1083_s3 + $0x8] sm:$0xff] (!%p640_p5)  ;;  %v471_v43 = vld [vmem:[%s1083_s3] sm:$0xff] (!%p640_p5) }
  0x87   : > { %v759_v40 = vpack.c.bf16 (!%p640_p5), %v325_v39, %v324_v38  ;;  %v480_v42 = vld [vmem:[%s1083_s3 + $0x48] sm:$0xff] (!%p640_p5)  ;;  %v479_v44 = vld [vmem:[%s1083_s3 + $0x40] sm:$0xff] (!%p640_p5)  ;;  %v474_v53 = vld [vmem:[%s1083_s3 + $0x18] sm:$0xff] (!%p640_p5) }
  0x88   : > { %v482_v54 = vld [vmem:[%s1083_s3 + $0x58] sm:$0xff] (!%p640_p5)  ;;  %v473_v55 = vld [vmem:[%s1083_s3 + $0x10] sm:$0xff] (!%p640_p5)  ;;  %v476_v1 = vld [vmem:[%s1083_s3 + $0x28] sm:$0xff] (!%p640_p5) }
  0x89   : > { %v481_v56 = vld [vmem:[%s1083_s3 + $0x50] sm:$0xff]  ;;  %v484_v2 = vld [vmem:[%s1083_s3 + $0x68] sm:$0xff]  ;;  %v475_v3 = vld [vmem:[%s1083_s3 + $0x20] sm:$0xff] }
  0x8a   : > { %v483_v4 = vld [vmem:[%s1083_s3 + $0x60] sm:$0xff]  ;;  %v478_v13 = vld [vmem:[%s1083_s3 + $0x38] sm:$0xff]  ;;  %v477_v15 = vld [vmem:[%s1083_s3 + $0x30] sm:$0xff] }
  0x8b   : > { %v486_v14 = vld [vmem:[%s1083_s3 + $0x78] sm:$0xff]  ;;  %v485_v16 = vld [vmem:[%s1083_s3 + $0x70] sm:$0xff] }
  0x8d   : > { %738 = vmatpush3.bf16.xpose.msra.mxu0 %v735_v22  ;;  %772 = vmatpush3.bf16.xpose.msra.mxu1 %v735_v22 }
  0x8e   : > { %740 = vmatprep.subr.bf16.mxu0 %v739_v26  ;;  %765 = vmatprep.subr.bf16.mxu1 %v739_v26 }
  0x95   : > { %742 = vmatpush3.bf16.xpose.msra.mxu0 %v739_v26  ;;  %773 = vmatpush3.bf16.xpose.msra.mxu1 %v739_v26 }
  0x96   : > { %744 = vmatprep.subr.bf16.mxu0 %v743_v29  ;;  %766 = vmatprep.subr.bf16.mxu1 %v743_v29 }
  0x9d   : > { %746 = vmatpush3.bf16.xpose.msra.mxu0 %v743_v29  ;;  %774 = vmatpush3.bf16.xpose.msra.mxu1 %v743_v29 }
  0x9e   : > { %748 = vmatprep.subr.bf16.mxu0 %v747_v31  ;;  %767 = vmatprep.subr.bf16.mxu1 %v747_v31 }
  0xa5   : > { %750 = vmatpush3.bf16.xpose.msra.mxu0 %v747_v31  ;;  %775 = vmatpush3.bf16.xpose.msra.mxu1 %v747_v31 }
  0xa6   : > { %752 = vmatprep.subr.bf16.mxu0 %v751_v34  ;;  %768 = vmatprep.subr.bf16.mxu1 %v751_v34 }
  0xad   : > { %754 = vmatpush3.bf16.xpose.msra.mxu0 %v751_v34  ;;  %776 = vmatpush3.bf16.xpose.msra.mxu1 %v751_v34 }
  0xae   : > { %756 = vmatprep.subr.bf16.mxu0 %v755_v37  ;;  %769 = vmatprep.subr.bf16.mxu1 %v755_v37 }
  0xb5   : > { %758 = vmatpush3.bf16.xpose.msra.mxu0 %v755_v37  ;;  %777 = vmatpush3.bf16.xpose.msra.mxu1 %v755_v37 }
  0xb6   : > { %760 = vmatprep.subr.bf16.mxu0 %v759_v40  ;;  %770 = vmatprep.subr.bf16.mxu1 %v759_v40 }
  0xbd   : > { %762 = vmatpush3.bf16.xpose.msra.mxu0 %v759_v40  ;;  %778 = vmatpush3.bf16.xpose.msra.mxu1 %v759_v40 }
  0xc4   : > { %708 = vmatmul.mubr.f32.vlgmr.msra.gmra.mrb[0].mxu0 %v311_v18  ;;  %720 = vmatmul.mubr.f32.vlgmr.msra.gmra.mrb[0].mxu1 %v319_v30 }
  0xc5   : > { %710 = vmatprep.mubr.f32.mxu0 %v312_v19  ;;  %722 = vmatprep.mubr.f32.mxu1 %v320_v32 }
  0xc8   : > { %711 = vmatmul.mubr.f32.gmra.mrb[2].mxu0 %v313_v21  ;;  %723 = vmatmul.mubr.f32.gmra.mrb[2].mxu1 %v321_v33 }
  0xc9   : > { %713 = vmatprep.mubr.f32.mxu0 %v314_v24  ;;  %725 = vmatprep.mubr.f32.mxu1 %v322_v35 }
  0xcc   : > { %714 = vmatmul.mubr.f32.gmra.mrb[4].mxu0 %v315_v25  ;;  %726 = vmatmul.mubr.f32.gmra.mrb[4].mxu1 %v323_v36 }
  0xcd   : > { %716 = vmatprep.mubr.f32.mxu0 %v316_v27  ;;  %728 = vmatprep.mubr.f32.mxu1 %v324_v38 }
  0xd0   : > { %717 = vmatmul.mubr.f32.gmra.mrb[6].mxu0 %v317_v28  ;;  %729 = vmatmul.mubr.f32.gmra.mrb[6].mxu1 %v325_v39 }
 0x197   : > { %v709_v45 = vpop.f32.mrb[0].mxu0  ;;  %v721_v46 = vpop.f32.mrb[0].mxu1 }
 0x198   : > { %v488_v47 = vadd.f32 %v709_v45, %v472_v41  ;;  %v496_v48 = vadd.f32 %v721_v46, %v480_v42  ;;  %v392_v49 = vpop.f32.mrb[1].mxu0  ;;  %v432_v50 = vpop.f32.mrb[1].mxu1 }
 0x199   : > { %v487_v51 = vadd.f32 %v471_v43, %v392_v49  ;;  %v495_v52 = vadd.f32 %v479_v44, %v432_v50 }
 0x19a   : > { %504 = vst [vmem:[%s1083_s3 + $0x8] sm:$0xff] %v488_v47  ;;  %512 = vst [vmem:[%s1083_s3 + $0x48] sm:$0xff] %v496_v48 }
 0x19b   : > { %503 = vst [vmem:[%s1083_s3] sm:$0xff] %v487_v51  ;;  %511 = vst [vmem:[%s1083_s3 + $0x40] sm:$0xff] %v495_v52  ;;  %v712_v57 = vpop.f32.mrb[2].mxu0  ;;  %v724_v58 = vpop.f32.mrb[2].mxu1 }
 0x19c   : > { %v490_v59 = vadd.f32 %v712_v57, %v474_v53  ;;  %v498_v60 = vadd.f32 %v724_v58, %v482_v54  ;;  %v402_v61 = vpop.f32.mrb[3].mxu0  ;;  %v442_v62 = vpop.f32.mrb[3].mxu1 }
 0x19d   : > { %v489_v63 = vadd.f32 %v473_v55, %v402_v61  ;;  %v497_v0 = vadd.f32 %v481_v56, %v442_v62 }
 0x19e   : > { %506 = vst [vmem:[%s1083_s3 + $0x18] sm:$0xff] %v490_v59  ;;  %514 = vst [vmem:[%s1083_s3 + $0x58] sm:$0xff] %v498_v60 }
 0x19f   : > { %505 = vst [vmem:[%s1083_s3 + $0x10] sm:$0xff] %v489_v63  ;;  %513 = vst [vmem:[%s1083_s3 + $0x50] sm:$0xff] %v497_v0  ;;  %v715_v5 = vpop.f32.mrb[4].mxu0  ;;  %v727_v6 = vpop.f32.mrb[4].mxu1 }
 0x1a0   : > { %v492_v7 = vadd.f32 %v715_v5, %v476_v1  ;;  %v500_v8 = vadd.f32 %v727_v6, %v484_v2  ;;  %v412_v9 = vpop.f32.mrb[5].mxu0  ;;  %v452_v10 = vpop.f32.mrb[5].mxu1 }
 0x1a1   : > { %v491_v11 = vadd.f32 %v475_v3, %v412_v9  ;;  %v499_v12 = vadd.f32 %v483_v4, %v452_v10 }
 0x1a2   : > { %508 = vst [vmem:[%s1083_s3 + $0x28] sm:$0xff] %v492_v7  ;;  %516 = vst [vmem:[%s1083_s3 + $0x68] sm:$0xff] %v500_v8 }
 0x1a3   : > { %507 = vst [vmem:[%s1083_s3 + $0x20] sm:$0xff] %v491_v11  ;;  %515 = vst [vmem:[%s1083_s3 + $0x60] sm:$0xff] %v499_v12  ;;  %v718_v17 = vpop.f32.mrb[6].mxu0  ;;  %v730_v18 = vpop.f32.mrb[6].mxu1 }
 0x1a4   : > { %v494_v19 = vadd.f32 %v718_v17, %v478_v13  ;;  %v502_v20 = vadd.f32 %v730_v18, %v486_v14  ;;  %v422_v21 = vpop.f32.mrb[7].mxu0  ;;  %v462_v22 = vpop.f32.mrb[7].mxu1 }
 0x1a5   : > { %v493_v23 = vadd.f32 %v477_v15, %v422_v21  ;;  %v501_v24 = vadd.f32 %v485_v16, %v462_v22 }
 0x1a6   : > { %510 = vst [vmem:[%s1083_s3 + $0x38] sm:$0xff] %v494_v19  ;;  %518 = vst [vmem:[%s1083_s3 + $0x78] sm:$0xff] %v502_v20 }
 0x1a7   : > { %509 = vst [vmem:[%s1083_s3 + $0x30] sm:$0xff] %v493_v23  ;;  %517 = vst [vmem:[%s1083_s3 + $0x70] sm:$0xff] %v501_v24 }
 0x1a8 PF: > { %s33_s15 = sadd.s32 1, %s944_s15   ;;  %s1179_s3 = smov %s924_s10 }
 0x1a9   : > { %p30_p6 = scmp.ge.s32.totalorder %s33_s15, 6   ;;  %s1180_s10 = smov %s1044_s26 }
 0x1aa   : > { %s1181_s11 = smov %s936_s13  ;;  %s1182_s12 = smov %s940_s14 }
 0x1ab   : > { %s1183_s13 = smov %s1188_s16  ;;  %s1184_s14 = smov %s1190_s17 }
 0x1ac   :  { %32 = sbr.rel (!%p30_p6) target bundleno = 50 (0x32), region = 105 }

</bundles_post_ra>
